<compile_context>
chip_gen: v7x
topology: tpu7x:2x2x1
jax: 0.10.0
libtpu: 0.0.40
codegen_flags: <defaults>
</compile_context>

<pallas_src>
import jax
import jax.numpy as jnp
from jax.experimental import pallas as pl
from jax.experimental.pallas import tpu as pltpu


def _round_up(x, m):
    return ((x + m - 1) // m) * m


def critic_kernel(xT_ref, w1_ref, b1_ref, w2_ref, b2_ref, w3_ref, b3_ref, o_ref):
    # xT: (D, TB) f32, batch on lanes.  w1/w2 bf16 in PyTorch (out, in) layout;
    # b1/b2/w3 are (features, 1) f32 columns; b3 is a (1, 1) SMEM scalar.
    x = xT_ref[...].astype(jnp.bfloat16)
    h1 = jnp.dot(w1_ref[...], x, preferred_element_type=jnp.float32) + b1_ref[...]
    h1 = jnp.maximum(h1, 0.0)
    h2 = jnp.dot(w2_ref[...], h1.astype(jnp.bfloat16),
                 preferred_element_type=jnp.float32) + b2_ref[...]
    h2 = jnp.maximum(h2, 0.0)
    # Final 256 -> 1 layer: VPU multiply + sublane (XLU) reduction -> (1, TB)
    # lane-dense block.  Avoids a lane-sparse MXU pass and masked 1-lane stores.
    o_ref[...] = jnp.sum(h2 * w3_ref[...], axis=0, keepdims=True) + b3_ref[0, 0]


def _choose_tile(B, max_tb=1024):
    # Lane-dense output => TB must be a multiple of 128.  The kernel is
    # fixed-overhead bound, so keep the grid short; but prefer >= 2 steps when
    # the batch allows so the "parallel" axis can shard across v7x's two TCs.
    TB = min(max_tb, _round_up(max((B + 1) // 2, 1), 128))
    B_pad = _round_up(B, TB)
    return TB, B_pad


def critic_forward(state, params, max_tb=1024):
    """state: [B, D] float32.  params: dict w1,b1,w2,b2,w3,b3 (kernel layout)."""
    B, D = state.shape
    w1, b1 = params["w1"], params["b1"]
    w2, b2 = params["w2"], params["b2"]
    w3, b3 = params["w3"], params["b3"]
    F1 = w1.shape[0]
    F2 = w2.shape[0]

    TB, B_pad = _choose_tile(B, max_tb)

    # Layout plumbing in the wrapper: put the batch on the lane axis.  state is
    # tiny (B x D f32), so this transpose/pad is negligible HBM traffic.
    xT = state.T
    if B_pad != B:
        xT = jnp.pad(xT, ((0, 0), (0, B_pad - B)))

    const = lambda i: (0, 0)  # same block every step -> VMEM-resident
    # (Total resident footprint ~0.3 MiB; VMEM is not a constraint on any
    # generation, so the default double-buffering of these constant blocks is
    # left as-is.)

    out = pl.pallas_call(
        critic_kernel,
        out_shape=jax.ShapeDtypeStruct((1, B_pad), jnp.float32),
        grid=(B_pad // TB,),
        in_specs=[
            pl.BlockSpec((D, TB), lambda i: (0, i)),            # x^T: batch tiled on lanes
            pl.BlockSpec((F1, D), const),                       # w1 (VMEM-resident)
            pl.BlockSpec((F1, 1), const),                       # b1 column
            pl.BlockSpec((F2, F1), const),                      # w2 (VMEM-resident)
            pl.BlockSpec((F2, 1), const),                       # b2 column
            pl.BlockSpec((F2, 1), const),                       # w3 column
            pl.BlockSpec(memory_space=pltpu.MemorySpace.SMEM),  # b3 scalar
        ],
        out_specs=pl.BlockSpec((1, TB), lambda i: (0, i)),      # lane-dense output
        compiler_params=pltpu.CompilerParams(
            # "parallel" shards the batch axis across TensorCores on v7x; if a
            # profile shows one TC idle, switch this axis to pltpu.CORE_PARALLEL.
            dimension_semantics=("parallel",)),
    )(xT, w1, b1, w2, b2, w3, b3)

    # Padded columns hold relu(bias)-derived garbage; slice before any use.
    return out[0, :B][:, None]


def init_params(key, input_dims, fc1_dims=256, fc2_dims=256):
    """PyTorch Linear default init (uniform +/- 1/sqrt(fan_in)), f32, stored in
    the kernel layout: w1/w2 (out, in); b1/b2 (out, 1) columns; w3 (fc2, 1)
    column; b3 (1, 1)."""
    ks = jax.random.split(key, 6)

    def lin(kw, kb, fan_in, fan_out):
        bound = 1.0 / jnp.sqrt(jnp.float32(fan_in))
        w = jax.random.uniform(kw, (fan_out, fan_in), jnp.float32, -bound, bound)
        b = jax.random.uniform(kb, (fan_out, 1), jnp.float32, -bound, bound)
        return w, b

    w1, b1 = lin(ks[0], ks[1], input_dims, fc1_dims)
    w2, b2 = lin(ks[2], ks[3], fc1_dims, fc2_dims)
    w3, b3 = lin(ks[4], ks[5], fc2_dims, 1)
    return {"w1": w1, "b1": b1, "w2": w2, "b2": b2, "w3": w3.T, "b3": b3}


def to_kernel_params(params_f32):
    """Cast the two hidden-layer weight matrices to bf16 for MXU-native storage."""
    p = dict(params_f32)
    p["w1"] = params_f32["w1"].astype(jnp.bfloat16)
    p["w2"] = params_f32["w2"].astype(jnp.bfloat16)
    return p


def critic_ref(state, params):
    """Pure-JAX reference mirroring the kernel's numerics (bf16 weights, f32 acc)."""
    xT = state.T.astype(jnp.bfloat16)
    h1 = jnp.maximum(jnp.dot(params["w1"], xT,
                             preferred_element_type=jnp.float32) + params["b1"], 0.0)
    h2 = jnp.maximum(jnp.dot(params["w2"], h1.astype(jnp.bfloat16),
                             preferred_element_type=jnp.float32) + params["b2"], 0.0)
    out = jnp.sum(h2 * params["w3"], axis=0, keepdims=True) + params["b3"]
    return out.T


def critic_ref_f32(state, params_f32):
    """Full-f32 reference matching the original PyTorch module's numerics."""
    h1 = jnp.maximum(state @ params_f32["w1"].T + params_f32["b1"].T, 0.0)
    h2 = jnp.maximum(h1 @ params_f32["w2"].T + params_f32["b2"].T, 0.0)
    return h2 @ params_f32["w3"] + params_f32["b3"]


# TODO(synk): optimizer (Adam) and checkpoint save/load from the PyTorch module
# are training/IO machinery, not part of the forward pass, and are not kerneled.

if __name__ == "__main__":
    key = jax.random.PRNGKey(0)
    k_param, k_state = jax.random.split(key)

    batch = 500          # not a multiple of the tile: exercises grid + lane padding
    input_dims = 8       # e.g. an 8-dim observation vector

    params_f32 = init_params(k_param, input_dims)
    params = to_kernel_params(params_f32)
    state = jax.random.normal(k_state, (batch, input_dims), jnp.float32)

    out = critic_forward(state, params)
    out = jax.block_until_ready(out)
    assert out.shape == (batch, 1), out.shape

    # Tight check vs a reference using the same bf16-weight / f32-accumulate path.
    ref = critic_ref(state, params)
    assert jnp.allclose(out, ref, atol=2e-3, rtol=2e-3), "mismatch vs bf16-path reference"

    # Loose check vs the PyTorch-equivalent full-f32 path: documents the bf16
    # weight-storage drift explicitly (~1% relative, acceptable for a PPO critic).
    ref32 = critic_ref_f32(state, params_f32)
    assert jnp.allclose(out, ref32, atol=5e-2, rtol=5e-2), "excessive drift vs f32 reference"

    print("KERNEL_OK")
</pallas_src>

<mosaic_0001>
module attributes {stable_mosaic.version = 11 : i64} {
  func.func @critic_kernel(%arg0: i32, %arg1: memref<8x256xf32, #tpu.memory_space<vmem>>, %arg2: memref<256x8xbf16, #tpu.memory_space<vmem>>, %arg3: memref<256x1xf32, #tpu.memory_space<vmem>>, %arg4: memref<256x256xbf16, #tpu.memory_space<vmem>>, %arg5: memref<256x1xf32, #tpu.memory_space<vmem>>, %arg6: memref<256x1xf32, #tpu.memory_space<vmem>>, %arg7: memref<1x1xf32, #tpu.memory_space<smem>>, %arg8: memref<1x256xf32, #tpu.memory_space<vmem>>) attributes {dimension_semantics = [#tpu.dimension_semantics<parallel>], iteration_bounds = array<i64: 2>, scalar_prefetch = 0 : i64, scratch_operands = 0 : i64, tpu.core_type = #tpu.core_type<tc>, window_params = [{transform_indices = @transform_0, window_bounds = array<i64: 8, 256>}, {pipeline_mode = #tpu.pipeline_mode<synchronous>, transform_indices = @transform_1, window_bounds = array<i64: 256, 8>}, {pipeline_mode = #tpu.pipeline_mode<synchronous>, transform_indices = @transform_2, window_bounds = array<i64: 256, 1>}, {pipeline_mode = #tpu.pipeline_mode<synchronous>, transform_indices = @transform_3, window_bounds = array<i64: 256, 256>}, {pipeline_mode = #tpu.pipeline_mode<synchronous>, transform_indices = @transform_4, window_bounds = array<i64: 256, 1>}, {pipeline_mode = #tpu.pipeline_mode<synchronous>, transform_indices = @transform_5, window_bounds = array<i64: 256, 1>}, {transform_indices = @transform_6, window_bounds = array<i64: 1, 1>}, {transform_indices = @transform_7, window_bounds = array<i64: 1, 256>}]} {
    %c0 = arith.constant 0 : index
    %c0_0 = arith.constant 0 : index
    %0 = vector.load %arg1[%c0, %c0_0] : memref<8x256xf32, #tpu.memory_space<vmem>>, vector<8x256xf32>
    %1 = arith.truncf %0 : vector<8x256xf32> to vector<8x256xbf16>
    %c0_1 = arith.constant 0 : index
    %c0_2 = arith.constant 0 : index
    %2 = vector.load %arg2[%c0_1, %c0_2] : memref<256x8xbf16, #tpu.memory_space<vmem>>, vector<256x8xbf16>
    %cst = arith.constant dense<0.000000e+00> : vector<256x256xf32>
    %3 = tpu.matmul %2, %1, %cst {dimension_numbers = #tpu.dot_dimension_numbers<[1], [0], [0], [1], [0, 0, 1, 1], [], []>} : vector<256x8xbf16>, vector<8x256xbf16>, vector<256x256xf32> -> vector<256x256xf32>
    %c0_3 = arith.constant 0 : index
    %c0_4 = arith.constant 0 : index
    %4 = vector.load %arg3[%c0_3, %c0_4] : memref<256x1xf32, #tpu.memory_space<vmem>>, vector<256x1xf32>
    %5 = vector.broadcast %4 : vector<256x1xf32> to vector<256x256xf32>
    %6 = arith.addf %3, %5 : vector<256x256xf32>
    %cst_5 = arith.constant 0.000000e+00 : f32
    %7 = vector.broadcast %cst_5 : f32 to vector<256x256xf32>
    %8 = arith.maximumf %6, %7 : vector<256x256xf32>
    %c0_6 = arith.constant 0 : index
    %c0_7 = arith.constant 0 : index
    %9 = vector.load %arg4[%c0_6, %c0_7] : memref<256x256xbf16, #tpu.memory_space<vmem>>, vector<256x256xbf16>
    %10 = arith.truncf %8 : vector<256x256xf32> to vector<256x256xbf16>
    %cst_8 = arith.constant dense<0.000000e+00> : vector<256x256xf32>
    %11 = tpu.matmul %9, %10, %cst_8 {dimension_numbers = #tpu.dot_dimension_numbers<[1], [0], [0], [1], [0, 0, 1, 1], [], []>} : vector<256x256xbf16>, vector<256x256xbf16>, vector<256x256xf32> -> vector<256x256xf32>
    %c0_9 = arith.constant 0 : index
    %c0_10 = arith.constant 0 : index
    %12 = vector.load %arg5[%c0_9, %c0_10] : memref<256x1xf32, #tpu.memory_space<vmem>>, vector<256x1xf32>
    %13 = vector.broadcast %12 : vector<256x1xf32> to vector<256x256xf32>
    %14 = arith.addf %11, %13 : vector<256x256xf32>
    %cst_11 = arith.constant 0.000000e+00 : f32
    %15 = vector.broadcast %cst_11 : f32 to vector<256x256xf32>
    %16 = arith.maximumf %14, %15 : vector<256x256xf32>
    %c0_12 = arith.constant 0 : index
    %c0_13 = arith.constant 0 : index
    %17 = vector.load %arg6[%c0_12, %c0_13] : memref<256x1xf32, #tpu.memory_space<vmem>>, vector<256x1xf32>
    %18 = vector.broadcast %17 : vector<256x1xf32> to vector<256x256xf32>
    %19 = arith.mulf %16, %18 : vector<256x256xf32>
    %cst_14 = arith.constant dense<0.000000e+00> : vector<256xf32>
    %20 = vector.multi_reduction <add>, %19, %cst_14 [0] : vector<256x256xf32> to vector<256xf32>
    %21 = vector.shape_cast %20 : vector<256xf32> to vector<1x256xf32>
    %c0_15 = arith.constant 0 : index
    %c0_16 = arith.constant 0 : index
    %22 = memref.load %arg7[%c0_15, %c0_16] : memref<1x1xf32, #tpu.memory_space<smem>>
    %23 = vector.broadcast %22 : f32 to vector<1x256xf32>
    %24 = arith.addf %21, %23 : vector<1x256xf32>
    %c0_17 = arith.constant 0 : index
    %c0_18 = arith.constant 0 : index
    %25 = vector.load %arg8[%c0_17, %c0_18] : memref<1x256xf32, #tpu.memory_space<vmem>>, vector<1x256xf32>
    tpu.vector_store %arg8[%c0_17, %c0_18], %24 {strides = array<i32>} : memref<1x256xf32, #tpu.memory_space<vmem>>, vector<1x256xf32>,
    return
  }
  func.func @transform_0(%arg0: i32) -> (i32, i32) {
    %c0_i32 = arith.constant 0 : i32
    %c0_i32_0 = arith.constant 0 : i32
    return %c0_i32, %arg0 : i32, i32
  }
  func.func @transform_1(%arg0: i32) -> (i32, i32) {
    %c0_i32 = arith.constant 0 : i32
    %c0_i32_0 = arith.constant 0 : i32
    %c0_i32_1 = arith.constant 0 : i32
    return %c0_i32, %c0_i32_0 : i32, i32
  }
  func.func @transform_2(%arg0: i32) -> (i32, i32) {
    %c0_i32 = arith.constant 0 : i32
    %c0_i32_0 = arith.constant 0 : i32
    %c0_i32_1 = arith.constant 0 : i32
    return %c0_i32, %c0_i32_0 : i32, i32
  }
  func.func @transform_3(%arg0: i32) -> (i32, i32) {
    %c0_i32 = arith.constant 0 : i32
    %c0_i32_0 = arith.constant 0 : i32
    %c0_i32_1 = arith.constant 0 : i32
    return %c0_i32, %c0_i32_0 : i32, i32
  }
  func.func @transform_4(%arg0: i32) -> (i32, i32) {
    %c0_i32 = arith.constant 0 : i32
    %c0_i32_0 = arith.constant 0 : i32
    %c0_i32_1 = arith.constant 0 : i32
    return %c0_i32, %c0_i32_0 : i32, i32
  }
  func.func @transform_5(%arg0: i32) -> (i32, i32) {
    %c0_i32 = arith.constant 0 : i32
    %c0_i32_0 = arith.constant 0 : i32
    %c0_i32_1 = arith.constant 0 : i32
    return %c0_i32, %c0_i32_0 : i32, i32
  }
  func.func @transform_6(%arg0: i32) -> (i32, i32) {
    %c0_i32 = arith.constant 0 : i32
    %c0_i32_0 = arith.constant 0 : i32
    %c0_i32_1 = arith.constant 0 : i32
    return %c0_i32, %c0_i32_0 : i32, i32
  }
  func.func @transform_7(%arg0: i32) -> (i32, i32) {
    %c0_i32 = arith.constant 0 : i32
    %c0_i32_0 = arith.constant 0 : i32
    return %c0_i32, %arg0 : i32, i32
  }
}

</mosaic_0001>

<bundles_post_ra>
// kernel: tpu_custom_call.1
= control target key start
LH: loop header
LB: loop body
LE: loop exit
PB: predicated region body
PF: predicated region fallthrough
CT: control target
= control target key end

     0   :  { %s3015_s0 = inlined_call_operand.vmem [shape: f32[8,512], index: 0, kind: input, shape index: {}]   ;;  %s3016_s1 = inlined_call_operand.vmem [shape: bf16[256,8], index: 1, kind: input, shape index: {}]   ;;  %s3017_s2 = inlined_call_operand.vmem [shape: f32[256,1], index: 2, kind: input, shape index: {}]   ;;  %s3018_s3 = inlined_call_operand.vmem [shape: bf16[256,256], index: 3, kind: input, shape index: {}]   ;;  %s3019_s4 = inlined_call_operand.vmem [shape: f32[256,1], index: 4, kind: input, shape index: {}]   ;;  %s3020_s5 = inlined_call_operand.vmem [shape: f32[256,1], index: 5, kind: input, shape index: {}]   ;;  %s3021_s6 = inlined_call_operand.<no memory space> [shape: f32[1,1], index: 6, kind: input, shape index: {}]   ;;  %s3022_s7 = inlined_call_operand.hbm [shape: f32[1,512], index: 7, kind: output, shape index: {}]  }
   0x1   :  { %12 = sst [smem:[#allocation2]] %s3021_s6 }
   0x2   :  { %13 = vsyncpa [#allocation4], 0 }
   0x3   :  { %15 = vsyncpa [#allocation4 + $0x1], 0  ;;  %s2334_s26 = smov 0   ;;  %s2336_s27 = smov 0  }
   0x4   :  { %s2338_s28 = smov 0   ;;  %s2340_s29 = smov 0  }
   0x5 LB: > { %s2355_s6 = sadd.s32 4294967295, %s2286_s29   ;;  %s2007_s30 = sadd.s32 4294967294, %s2286_s29   ;;  %s2286_s29 = sphi %s2340_s29, %s3028_s29   ;;  %s2282_s28 = sphi %s2338_s28, %s3027_s28   ;;  %s2278_s27 = sphi %s2336_s27, %s3026_s27   ;;  %s2274_s26 = sphi %s2334_s26, %s3025_s26  }
   0x6   : > { %s2359_s8 = sadd.s32 1, %s2286_s29   ;;  %s180_s9 = sadd.s32 1, %s2282_s28 }
   0x7   : > { %s177_s10 = ssub.s32 %s2286_s29, %s2359_s8  ;;  %p190_p0 = scmp.ne.s32.totalorder %s2282_s28, %s2278_s27 }
   0x8   : > { %p178_p1 = scmp.eq.s32.totalorder %s177_s10, 0  ;;  %p191_p2 = scmp.eq.s32.totalorder %s2355_s6, 1 }
   0x9   : > { %p196_p3 = scmp.ne.s32.totalorder %s2278_s27, %s2274_s26  ;;  %p197_p4 = scmp.eq.s32.totalorder %s2007_s30, 1 }
   0xa   : > { %s2370_s11 = scalar_select %p178_p1, %s2282_s28, %s180_s9  }
   0xb   : > { %p2372_p5 = por %p191_p2, %p190_p0  ;;  %p2376_p6 = por %p197_p4, %p196_p3 }
   0xc   : > { %p2010_p7 = scmp.ge.s32.totalorder %s2286_s29, 1  ;;  %p242_p8 = scmp.lt.s32.totalorder %s2286_s29, 3 }
   0xe   : > { %p243_p9 = pnand %p2010_p7, %p242_p8 }
   0xf   : > { %v320_v0 = vld [vmem:[%s3017_s2 + $0x10] sm:$0xff] (!%p243_p9)  ;;  %v318_v1 = vld [vmem:[%s3017_s2] sm:$0xff] (!%p243_p9)  ;;  %s2012_s18 = sshll.u32 (!%p243_p9), %s2355_s6, 1  ;;  %v2288_v2 = vmov (!%p243_p9), 0   ;;  %v321_v3 = vld [vmem:[%s3017_s2 + $0x18] sm:$0xff] (!%p243_p9)  ;;  %vm639_vm0 = vcmask (!%p243_p9), 1043456  }
  0x10   : > { %246 = sbr.rel (%p243_p9) target bundleno = 731 (0x2db), region = 48  ;;  %2159 = vset.pattern.permute.xlu1 (!%p243_p9), %v2288_v2  ;;  %2158 = vset.pattern.permute.xlu0 (!%p243_p9), %v2288_v2  ;;  %p275_p10 = scmp.lt.s32.totalorder (!%p243_p9), %s2012_s18, 3  ;;  %v319_v4 = vld [vmem:[%s3017_s2 + $0x8] sm:$0xff] (!%p243_p9)  ;;  %v322_v6 = vld [vmem:[%s3017_s2 + $0x20] sm:$0xff] (!%p243_p9)  ;;  %v325_v12 = vld [vmem:[%s3017_s2 + $0x38] sm:$0xff] (!%p243_p9)  ;;  %vm590_vm1 = vcmask (!%p243_p9), 64512  }
  0x11   : > { %362 = vperm.xlu1 (!%p243_p9), %2159, %v320_v0   ;;  %352 = vperm.xlu0 (!%p243_p9), %2158, %v318_v1   ;;  %v323_v5 = vld [vmem:[%s3017_s2 + $0x28] sm:$0xff] (!%p243_p9)  ;;  %v324_v13 = vld [vmem:[%s3017_s2 + $0x30] sm:$0xff] (!%p243_p9)  ;;  %v2160_v14 = vld [vmem:[%s3016_s1] sm:$0xff] (!%p243_p9)   ;;  %s1906_s22 = sld [smem:[#allocation2]] (!%p243_p9)  ;;  %s2084_s25 = sshll.u32 (!%p243_p9), %s2355_s6, 5 }
  0x12   : > { %678 = vmatprep.mubr.bf16.mxu0 (!%p243_p9), %v2288_v2  ;;  %v327_v15 = vld [vmem:[%s3017_s2 + $0x48] sm:$0xff] (!%p243_p9)  ;;  %v326_v16 = vld [vmem:[%s3017_s2 + $0x40] sm:$0xff] (!%p243_p9)  ;;  %v329_v17 = vld [vmem:[%s3017_s2 + $0x58] sm:$0xff] (!%p243_p9)  ;;  %s2973_s15 = scalar_lea.hbm (!%p243_p9), %s3022_s7, %s2084_s25  ;;  %s2290_s6 = smov (!%p243_p9), [#allocation3]  }
  0x13   : > { %v328_v18 = vld [vmem:[%s3017_s2 + $0x50] sm:$0xff] (!%p243_p9)  ;;  %v2161_v19 = vld [vmem:[%s3016_s1 + $0x8] sm:$0xff] (!%p243_p9)   ;;  %v330_v21 = vld [vmem:[%s3017_s2 + $0x60] sm:$0xff] (!%p243_p9) }
  0x14   : > { %v331_v20 = vld [vmem:[%s3017_s2 + $0x68] sm:$0xff] (!%p243_p9)  ;;  %v333_v22 = vld [vmem:[%s3017_s2 + $0x78] sm:$0xff] (!%p243_p9)  ;;  %v332_v23 = vld [vmem:[%s3017_s2 + $0x70] sm:$0xff] (!%p243_p9) }
  0x15   : > { %367 = vperm.xlu1 (!%p243_p9), %2159, %v321_v3   ;;  %357 = vperm.xlu0 (!%p243_p9), %2158, %v319_v4   ;;  %v2162_v24 = vld [vmem:[%s3016_s1 + $0x10] sm:$0xff] (!%p243_p9)   ;;  %v335_v25 = vld [vmem:[%s3017_s2 + $0x88] sm:$0xff] (!%p243_p9)  ;;  %v334_v26 = vld [vmem:[%s3017_s2 + $0x80] sm:$0xff] (!%p243_p9) }
  0x16   : > { %v337_v27 = vld [vmem:[%s3017_s2 + $0x98] sm:$0xff] (!%p243_p9)  ;;  %v336_v28 = vld [vmem:[%s3017_s2 + $0x90] sm:$0xff] (!%p243_p9)  ;;  %v339_v30 = vld [vmem:[%s3017_s2 + $0xa8] sm:$0xff] (!%p243_p9) }
  0x17   : > { %s3030_s18 = smov (!%p275_p10, %s2012_s18), 3  ;;  %v2163_v29 = vld [vmem:[%s3016_s1 + $0x18] sm:$0xff]   ;;  %v338_v31 = vld [vmem:[%s3017_s2 + $0xa0] sm:$0xff]  ;;  %v340_v33 = vld [vmem:[%s3017_s2 + $0xb0] sm:$0xff] }
  0x18   : > { %s2013_s23 = sshll.u32 %s3030_s18, 3  ;;  %v341_v32 = vld [vmem:[%s3017_s2 + $0xb8] sm:$0xff]  ;;  %v2164_v34 = vld [vmem:[%s3016_s1 + $0x20] sm:$0xff]   ;;  %v343_v35 = vld [vmem:[%s3017_s2 + $0xc8] sm:$0xff]  ;;  %s2228_s18 = sshll.u32 %s2290_s6, 4  ;;  %s2229_s18 = int_to_ptr.vmem [resolvable:$false] %s2228_s18 }
  0x19   : > { %s278_s10 = scalar_lea.vmem %s3015_s0, %s2013_s23  ;;  %377 = vperm.xlu1 %2159, %v323_v5   ;;  %372 = vperm.xlu0 %2158, %v322_v6   ;;  %v342_v36 = vld [vmem:[%s3017_s2 + $0xc0] sm:$0xff]  ;;  %v345_v37 = vld [vmem:[%s3017_s2 + $0xd8] sm:$0xff]  ;;  %v344_v38 = vld [vmem:[%s3017_s2 + $0xd0] sm:$0xff]  ;;  %s271_s23 = sand.u32 1, %s2278_s27  }
  0x1a   : > { %v283_v7 = vld [vmem:[%s278_s10 + $0x8] sm:$0xff]  ;;  %v282_v8 = vld [vmem:[%s278_s10] sm:$0xff]  ;;  %v349_v42 = vld [vmem:[%s3017_s2 + $0xf8] sm:$0xff]  ;;  %s2011_s24 = sshll.u32 %s271_s23, 1  ;;  %s1934_s16 = scalar_lea.sflag [#allocation4], %s271_s23 }
  0x1b   : > { %v285_v9 = vpack.c.bf16 %v283_v7, %v283_v7  ;;  %v284_v10 = vpack.c.bf16 %v282_v8, %v282_v8  ;;  %v2165_v39 = vld [vmem:[%s3016_s1 + $0x28] sm:$0xff]   ;;  %v346_v41 = vld [vmem:[%s3017_s2 + $0xe0] sm:$0xff]  ;;  %v348_v43 = vld [vmem:[%s3017_s2 + $0xf0] sm:$0xff]  ;;  %s273_s30 = scalar_lea.vmem [#allocation3], %s2011_s24  ;;  %s2230_s19 = scalar_lea.vmem %s2229_s18, 64 }
  0x1c   : > { %v347_v40 = vld [vmem:[%s3017_s2 + $0xe8] sm:$0xff]  ;;  %v2166_v44 = vld [vmem:[%s3016_s1 + $0x30] sm:$0xff]   ;;  %v967_v46 = vld [vmem:[%s3019_s4] sm:$0xff]  ;;  %s1948_s9 = sshll.u32 %s273_s30, 4  ;;  %s2975_s9 = int_to_ptr.vmem [resolvable:$true] %s1948_s9 }
  0x1d   : > { %v641_v11 = vsel %vm639_vm0, %v284_v10, 0  ;;  %2030 = vmatprep.subr.msk.bf16.mxu0 %vm639_vm0, %v285_v9  ;;  %387 = vperm.xlu1 %2159, %v325_v12   ;;  %v968_v45 = vld [vmem:[%s3019_s4 + $0x8] sm:$0xff]  ;;  %v970_v47 = vld [vmem:[%s3019_s4 + $0x18] sm:$0xff]  ;;  %v969_v48 = vld [vmem:[%s3019_s4 + $0x10] sm:$0xff]  ;;  %s2224_s17 = scalar_lea.vmem %s2975_s9, 32  ;;  %p2231_p0 = scmp.lt.s32.totalorder %s2975_s9, %s2229_s18 }
  0x1e   : > { %647 = vmatpush1.bf16.msra.mxu0 %v641_v11  ;;  %382 = vperm.xlu0 %2158, %v324_v13   ;;  %v2167_v49 = vld [vmem:[%s3016_s1 + $0x38] sm:$0xff]   ;;  %v972_v50 = vld [vmem:[%s3019_s4 + $0x28] sm:$0xff]  ;;  %v971_v51 = vld [vmem:[%s3019_s4 + $0x20] sm:$0xff]  ;;  %p2225_p11 = scmp.ne.s32.totalorder %s2975_s9, %s2224_s17  ;;  %p2232_p1 = scmp.lt.s32.totalorder %s2230_s19, %s2224_s17 }
  0x1f   : > { %v974_v52 = vld [vmem:[%s3019_s4 + $0x38] sm:$0xff]  ;;  %v973_v53 = vld [vmem:[%s3019_s4 + $0x30] sm:$0xff]  ;;  %v2168_v54 = vld [vmem:[%s3016_s1 + $0x40] sm:$0xff]  }
  0x20   : > { %v976_v55 = vld [vmem:[%s3019_s4 + $0x48] sm:$0xff]  ;;  %v975_v56 = vld [vmem:[%s3019_s4 + $0x40] sm:$0xff]  ;;  %v978_v57 = vld [vmem:[%s3019_s4 + $0x58] sm:$0xff]  ;;  %p2226_p12 = pnand %p2225_p11, %p2372_p5  ;;  %p2233_p2 = por %p2232_p1, %p2231_p0 }
  0x21   : > { %2031 = vmatmul.mubr.msk.bf16.vlgmr.msra.gmra.mrb[0].mxu0 %vm590_vm1, %v2160_v14  ;;  %397 = vperm.xlu1 %2159, %v327_v15   ;;  %v977_v58 = vld [vmem:[%s3019_s4 + $0x50] sm:$0xff]  ;;  %v2169_v59 = vld [vmem:[%s3016_s1 + $0x48] sm:$0xff]   ;;  %v979_v61 = vld [vmem:[%s3019_s4 + $0x60] sm:$0xff] }
  0x22   : > { %688 = vmatprep.mubr.bf16.mxu0 %v2288_v2  ;;  %392 = vperm.xlu0 %2158, %v326_v16   ;;  %v980_v60 = vld [vmem:[%s3019_s4 + $0x68] sm:$0xff]  ;;  %v982_v62 = vld [vmem:[%s3019_s4 + $0x78] sm:$0xff]  ;;  %v981_v63 = vld [vmem:[%s3019_s4 + $0x70] sm:$0xff]  ;;  %p2227_p13 = pneg %p2226_p12 }
  0x23   : > { %v2170_v0 = vld [vmem:[%s3016_s1 + $0x50] sm:$0xff]   ;;  %v984_v1 = vld [vmem:[%s3019_s4 + $0x88] sm:$0xff]  ;;  %v983_v3 = vld [vmem:[%s3019_s4 + $0x80] sm:$0xff] }
  0x24   : > { %v986_v4 = vld [vmem:[%s3019_s4 + $0x98] sm:$0xff]  ;;  %v985_v5 = vld [vmem:[%s3019_s4 + $0x90] sm:$0xff]  ;;  %v988_v7 = vld [vmem:[%s3019_s4 + $0xa8] sm:$0xff]  ;;  %p2234_p3 = pnand %p2233_p2, %p2227_p13 }
  0x25   : > { %407 = vperm.xlu1 %2159, %v329_v17   ;;  %v2171_v6 = vld [vmem:[%s3016_s1 + $0x58] sm:$0xff]   ;;  %v987_v8 = vld [vmem:[%s3019_s4 + $0xa0] sm:$0xff]  ;;  %v989_v10 = vld [vmem:[%s3019_s4 + $0xb0] sm:$0xff] }
  0x26   : > { %402 = vperm.xlu0 %2158, %v328_v18   ;;  %v990_v9 = vld [vmem:[%s3019_s4 + $0xb8] sm:$0xff]  ;;  %v2172_v11 = vld [vmem:[%s3016_s1 + $0x60] sm:$0xff]   ;;  %v992_v12 = vld [vmem:[%s3019_s4 + $0xc8] sm:$0xff] }
  0x27   : > { %v991_v13 = vld [vmem:[%s3019_s4 + $0xc0] sm:$0xff]  ;;  %v993_v15 = vld [vmem:[%s3019_s4 + $0xd0] sm:$0xff]  ;;  %v2173_v16 = vld [vmem:[%s3016_s1 + $0x68] sm:$0xff]  }
  0x28   : > { %v1576_v14 = vld [vmem:[%s3020_s5] sm:$0xff]  ;;  %v1578_v17 = vld [vmem:[%s3020_s5 + $0x10] sm:$0xff]  ;;  %v1577_v18 = vld [vmem:[%s3020_s5 + $0x8] sm:$0xff] }
  0x29   : > { %2032 = vmatmul.mubr.msk.bf16.gmra.mrb[4].mxu0 %vm590_vm1, %v2161_v19  ;;  %417 = vperm.xlu1 %2159, %v331_v20   ;;  %v1580_v19 = vld [vmem:[%s3020_s5 + $0x20] sm:$0xff]  ;;  %v1579_v20 = vld [vmem:[%s3020_s5 + $0x18] sm:$0xff] }
  0x2a   : > { %698 = vmatprep.mubr.bf16.mxu0 %v2288_v2  ;;  %412 = vperm.xlu0 %2158, %v330_v21   ;;  %v2174_v21 = vld [vmem:[%s3016_s1 + $0x70] sm:$0xff]  }
  0x2d   : > { %427 = vperm.xlu1 %2159, %v333_v22   ;;  %v1582_v22 = vld [vmem:[%s3020_s5 + $0x30] sm:$0xff] }
  0x2e   : > { %422 = vperm.xlu0 %2158, %v332_v23   ;;  %v1581_v23 = vld [vmem:[%s3020_s5 + $0x28] sm:$0xff] }
  0x31   : > { %2033 = vmatmul.mubr.msk.bf16.gmra.mrb[8].mxu0 %vm590_vm1, %v2162_v24  ;;  %437 = vperm.xlu1 %2159, %v335_v25   ;;  %v1584_v24 = vld [vmem:[%s3020_s5 + $0x40] sm:$0xff]  ;;  %v1583_v25 = vld [vmem:[%s3020_s5 + $0x38] sm:$0xff] }
  0x32   : > { %708 = vmatprep.mubr.bf16.mxu0 %v2288_v2  ;;  %432 = vperm.xlu0 %2158, %v334_v26   ;;  %v2175_v26 = vld [vmem:[%s3016_s1 + $0x78] sm:$0xff]  }
  0x35   : > { %447 = vperm.xlu1 %2159, %v337_v27   ;;  %v1585_v27 = vld [vmem:[%s3020_s5 + $0x48] sm:$0xff] }
  0x36   : > { %442 = vperm.xlu0 %2158, %v336_v28   ;;  %v1588_v28 = vld [vmem:[%s3020_s5 + $0x60] sm:$0xff] }
  0x39   : > { %2034 = vmatmul.mubr.msk.bf16.gmra.mrb[12].mxu0 %vm590_vm1, %v2163_v29  ;;  %457 = vperm.xlu1 %2159, %v339_v30   ;;  %v1587_v29 = vld [vmem:[%s3020_s5 + $0x58] sm:$0xff]  ;;  %v1590_v30 = vld [vmem:[%s3020_s5 + $0x70] sm:$0xff] }
  0x3a   : > { %718 = vmatprep.mubr.bf16.mxu0 %v2288_v2  ;;  %452 = vperm.xlu0 %2158, %v338_v31   ;;  %v1589_v31 = vld [vmem:[%s3020_s5 + $0x68] sm:$0xff] }
  0x3d   : > { %467 = vperm.xlu1 %2159, %v341_v32   ;;  %v1592_v32 = vld [vmem:[%s3020_s5 + $0x80] sm:$0xff] }
  0x3e   : > { %462 = vperm.xlu0 %2158, %v340_v33   ;;  %v1591_v33 = vld [vmem:[%s3020_s5 + $0x78] sm:$0xff] }
  0x41   : > { %2035 = vmatmul.mubr.msk.bf16.gmra.mrb[16].mxu0 %vm590_vm1, %v2164_v34  ;;  %477 = vperm.xlu1 %2159, %v343_v35   ;;  %v1594_v34 = vld [vmem:[%s3020_s5 + $0x90] sm:$0xff]  ;;  %v1593_v35 = vld [vmem:[%s3020_s5 + $0x88] sm:$0xff] }
  0x42   : > { %728 = vmatprep.mubr.bf16.mxu0 %v2288_v2  ;;  %472 = vperm.xlu0 %2158, %v342_v36   ;;  %v1596_v36 = vld [vmem:[%s3020_s5 + $0xa0] sm:$0xff] }
  0x45   : > { %487 = vperm.xlu1 %2159, %v345_v37   ;;  %v1595_v37 = vld [vmem:[%s3020_s5 + $0x98] sm:$0xff] }
  0x46   : > { %482 = vperm.xlu0 %2158, %v344_v38   ;;  %v1598_v38 = vld [vmem:[%s3020_s5 + $0xb0] sm:$0xff] }
  0x49   : > { %2036 = vmatmul.mubr.msk.bf16.gmra.mrb[20].mxu0 %vm590_vm1, %v2165_v39  ;;  %497 = vperm.xlu1 %2159, %v347_v40   ;;  %v1597_v39 = vld [vmem:[%s3020_s5 + $0xa8] sm:$0xff]  ;;  %v1600_v40 = vld [vmem:[%s3020_s5 + $0xc0] sm:$0xff] }
  0x4a   : > { %738 = vmatprep.mubr.bf16.mxu0 %v2288_v2  ;;  %492 = vperm.xlu0 %2158, %v346_v41   ;;  %v1599_v41 = vld [vmem:[%s3020_s5 + $0xb8] sm:$0xff] }
  0x4d   : > { %507 = vperm.xlu1 %2159, %v349_v42   ;;  %v1601_v42 = vld [vmem:[%s3020_s5 + $0xc8] sm:$0xff] }
  0x4e   : > { %502 = vperm.xlu0 %2158, %v348_v43   ;;  %v994_v43 = vld [vmem:[%s3019_s4 + $0xd8] sm:$0xff] }
  0x51   : > { %2037 = vmatmul.mubr.msk.bf16.gmra.mrb[24].mxu0 %vm590_vm1, %v2166_v44  ;;  %1006 = vperm.xlu1 %2159, %v968_v45   ;;  %v1602_v44 = vld [vmem:[%s3020_s5 + $0xd0] sm:$0xff]  ;;  %v995_v45 = vld [vmem:[%s3019_s4 + $0xe0] sm:$0xff] }
  0x52   : > { %748 = vmatprep.mubr.bf16.mxu0 %v2288_v2  ;;  %1001 = vperm.xlu0 %2158, %v967_v46   ;;  %v1603_v46 = vld [vmem:[%s3020_s5 + $0xd8] sm:$0xff] }
  0x55   : > { %1016 = vperm.xlu1 %2159, %v970_v47   ;;  %v996_v47 = vld [vmem:[%s3019_s4 + $0xe8] sm:$0xff] }
  0x56   : > { %1011 = vperm.xlu0 %2158, %v969_v48   ;;  %v1604_v48 = vld [vmem:[%s3020_s5 + $0xe0] sm:$0xff] }
  0x59   : > { %2038 = vmatmul.mubr.msk.bf16.gmra.mrb[28].mxu0 %vm590_vm1, %v2167_v49  ;;  %1026 = vperm.xlu1 %2159, %v972_v50   ;;  %v997_v49 = vld [vmem:[%s3019_s4 + $0xf0] sm:$0xff]  ;;  %v1605_v50 = vld [vmem:[%s3020_s5 + $0xe8] sm:$0xff] }
  0x5a   : > { %758 = vmatprep.mubr.bf16.mxu0 %v2288_v2  ;;  %1021 = vperm.xlu0 %2158, %v971_v51   ;;  %v998_v51 = vld [vmem:[%s3019_s4 + $0xf8] sm:$0xff] }
  0x5d   : > { %1036 = vperm.xlu1 %2159, %v974_v52   ;;  %v1607_v52 = vld [vmem:[%s3020_s5 + $0xf8] sm:$0xff] }
  0x5e   : > { %1031 = vperm.xlu0 %2158, %v973_v53   ;;  %v1606_v53 = vld [vmem:[%s3020_s5 + $0xf0] sm:$0xff] }
  0x61   : > { %2039 = vmatmul.mubr.msk.bf16.gmra.mrb[32].mxu0 %vm590_vm1, %v2168_v54  ;;  %1046 = vperm.xlu1 %2159, %v976_v55  }
  0x62   : > { %768 = vmatprep.mubr.bf16.mxu0 %v2288_v2  ;;  %1041 = vperm.xlu0 %2158, %v975_v56  }
  0x65   : > { %1056 = vperm.xlu1 %2159, %v978_v57  }
  0x66   : > { %1051 = vperm.xlu0 %2158, %v977_v58  }
  0x69   : > { %2040 = vmatmul.mubr.msk.bf16.gmra.mrb[36].mxu0 %vm590_vm1, %v2169_v59  ;;  %1066 = vperm.xlu1 %2159, %v980_v60  }
  0x6a   : > { %778 = vmatprep.mubr.bf16.mxu0 %v2288_v2  ;;  %1061 = vperm.xlu0 %2158, %v979_v61  }
  0x6d   : > { %1076 = vperm.xlu1 %2159, %v982_v62  }
  0x6e   : > { %1071 = vperm.xlu0 %2158, %v981_v63   ;;  %v2178_v63 = vld [vmem:[%s3018_s3 + $0x4] ss:$8 sps:$4 sm:$0xff]  }
  0x71   : > { %2041 = vmatmul.mubr.msk.bf16.gmra.mrb[40].mxu0 %vm590_vm1, %v2170_v0  ;;  %1086 = vperm.xlu1 %2159, %v984_v1  }
  0x72   : > { %788 = vmatprep.mubr.bf16.mxu0 %v2288_v2  ;;  %1081 = vperm.xlu0 %2158, %v983_v3   ;;  %v2181_v3 = vld [vmem:[%s3018_s3 + $0x34] ss:$8 sps:$4 sm:$0xff]  }
  0x73   : > { %1381 = vmatprep.mubr.bf16.mxu1 %v2181_v3 }
  0x75   : > { %1096 = vperm.xlu1 %2159, %v986_v4  }
  0x76   : > { %1091 = vperm.xlu0 %2158, %v985_v5  }
  0x79   : > { %2042 = vmatmul.mubr.msk.bf16.gmra.mrb[44].mxu0 %vm590_vm1, %v2171_v6  ;;  %1106 = vperm.xlu1 %2159, %v988_v7  }
  0x7a   : > { %798 = vmatprep.mubr.bf16.mxu0 %v2288_v2  ;;  %1101 = vperm.xlu0 %2158, %v987_v8  }
  0x7d   : > { %1116 = vperm.xlu1 %2159, %v990_v9  }
  0x7e   : > { %1111 = vperm.xlu0 %2158, %v989_v10  }
  0x81   : > { %2043 = vmatmul.mubr.msk.bf16.gmra.mrb[48].mxu0 %vm590_vm1, %v2172_v11  ;;  %1126 = vperm.xlu1 %2159, %v992_v12  }
  0x82   : > { %808 = vmatprep.mubr.bf16.mxu0 %v2288_v2  ;;  %1121 = vperm.xlu0 %2158, %v991_v13  }
  0x85   : > { %1610 = vperm.xlu1 %2159, %v1576_v14  }
  0x86   : > { %1131 = vperm.xlu0 %2158, %v993_v15  }
  0x89   : > { %2044 = vmatmul.mubr.msk.bf16.gmra.mrb[52].mxu0 %vm590_vm1, %v2173_v16  ;;  %1620 = vperm.xlu1 %2159, %v1578_v17  }
  0x8a   : > { %818 = vmatprep.mubr.bf16.mxu0 %v2288_v2  ;;  %1615 = vperm.xlu0 %2158, %v1577_v18  }
  0x8d   : > { %1630 = vperm.xlu1 %2159, %v1580_v19  }
  0x8e   : > { %1625 = vperm.xlu0 %2158, %v1579_v20  }
  0x90   : > { %v353_v54 = vpop.permute.xlu0 %352  ;;  %v363_v0 = vpop.permute.xlu1 %362 }
  0x91   : > { %2045 = vmatmul.mubr.msk.bf16.gmra.mrb[56].mxu0 %vm590_vm1, %v2174_v21  ;;  %1640 = vperm.xlu1 %2159, %v1582_v22  }
  0x92   : > { %828 = vmatprep.mubr.bf16.mxu0 %v2288_v2  ;;  %1635 = vperm.xlu0 %2158, %v1581_v23   ;;  %v1586_v2 = vld [vmem:[%s3020_s5 + $0x50] sm:$0xff] }
  0x94   : > { %v358_v58 = vpop.permute.xlu0 %357  ;;  %v368_v13 = vpop.permute.xlu1 %367 }
  0x95   : > { %1650 = vperm.xlu1 %2159, %v1584_v24  }
  0x96   : > { %1645 = vperm.xlu0 %2158, %v1583_v25  }
  0x98   : > { %v373_v24 = vpop.permute.xlu0 %372 }
  0x99   : > { %2046 = vmatmul.mubr.msk.bf16.gmra.mrb[60].mxu0 %vm590_vm1, %v2175_v26  ;;  %1660 = vperm.xlu1 %2159, %v1586_v2  }
  0x9a   : > { %1655 = vperm.xlu0 %2158, %v1585_v27   ;;  %1351 = vmatprep.mubr.bf16.mxu0 %v2178_v63 }
  0x9d   : > { %1670 = vperm.xlu1 %2159, %v1588_v28   ;;  %v378_v28 = vpop.permute.xlu1 %377 }
  0x9e   : > { %1665 = vperm.xlu0 %2158, %v1587_v29  }
  0xa1   : > { %1680 = vperm.xlu1 %2159, %v1590_v30  }
  0xa2   : > { %1675 = vperm.xlu0 %2158, %v1589_v31  }
  0xa5   : > { %1690 = vperm.xlu1 %2159, %v1592_v32  }
  0xa6   : > { %1685 = vperm.xlu0 %2158, %v1591_v33  }
  0xa9   : > { %1700 = vperm.xlu1 %2159, %v1594_v34  }
  0xaa   : > { %1695 = vperm.xlu0 %2158, %v1593_v35  }
  0xad   : > { %1710 = vperm.xlu1 %2159, %v1596_v36  }
  0xae   : > { %1705 = vperm.xlu0 %2158, %v1595_v37  }
  0xb1   : > { %1720 = vperm.xlu1 %2159, %v1598_v38  }
  0xb2   : > { %1715 = vperm.xlu0 %2158, %v1597_v39   ;;  %v383_v39 = vpop.permute.xlu0 %382 }
  0xb5   : > { %1730 = vperm.xlu1 %2159, %v1600_v40  }
  0xb6   : > { %1725 = vperm.xlu0 %2158, %v1599_v41  }
  0xb9   : > { %1735 = vperm.xlu1 %2159, %v1601_v42  }
  0xba   : > { %1136 = vperm.xlu0 %2158, %v994_v43  }
  0xbd   : > { %1740 = vperm.xlu1 %2159, %v1602_v44   ;;  %v388_v44 = vpop.permute.xlu1 %387 }
  0xbe   : > { %1141 = vperm.xlu0 %2158, %v995_v45  }
  0xc1   : > { %1745 = vperm.xlu1 %2159, %v1603_v46  }
  0xc2   : > { %1146 = vperm.xlu0 %2158, %v996_v47  }
  0xc5   : > { %1750 = vperm.xlu1 %2159, %v1604_v48  }
  0xc6   : > { %1151 = vperm.xlu0 %2158, %v997_v49  }
  0xc9   : > { %1755 = vperm.xlu1 %2159, %v1605_v50  }
  0xca   : > { %1156 = vperm.xlu0 %2158, %v998_v51  }
  0xcd   : > { %1765 = vperm.xlu1 %2159, %v1607_v52  }
  0xce   : > { %1760 = vperm.xlu0 %2158, %v1606_v53  }
  0xf4   : > { %v680_v55 = vpop.f32.mrb[0].mxu0 }
  0xf5   : > { %v681_v56 = vadd.f32 %v680_v55, %v353_v54  ;;  %v682_v57 = vpop.f32.mrb[1].mxu0  ;;  %v393_v55 = vpop.permute.xlu0 %392 }
  0xf6   : > { %v683_v59 = vadd.f32 %v682_v57, %v353_v54  ;;  %v684_v60 = vpop.f32.mrb[2].mxu0 }
  0xf7   : > { %v685_v61 = vadd.f32 %v684_v60, %v358_v58  ;;  %v686_v62 = vpop.f32.mrb[3].mxu0  ;;  %v839_v4 = vmax.f32 %v681_v56, 0.0  ;;  %v398_v60 = vpop.permute.xlu1 %397 }
  0xf8   : > { %v687_v1 = vadd.f32 %v686_v62, %v358_v58  ;;  %v840_v6 = vmax.f32 %v683_v59, 0.0 }
  0xf9   : > { %v841_v5 = vmax.f32 %v685_v61, 0.0 }
  0xfa   : > { %v842_v7 = vmax.f32 %v687_v1, 0.0 }
  0xfb   : > { %v935_v8 = vpack.c.bf16 %v841_v5, %v839_v4 }
  0xfc   : > { %v936_v9 = vpack.c.bf16 %v842_v7, %v840_v6  ;;  %v690_v10 = vpop.f32.mrb[4].mxu0 }
  0xfd   : > { %v691_v11 = vadd.f32 %v690_v10, %v363_v0  ;;  %v692_v12 = vpop.f32.mrb[5].mxu0 }
  0xfe   : > { %v693_v14 = vadd.f32 %v692_v12, %v363_v0  ;;  %v694_v15 = vpop.f32.mrb[6].mxu0  ;;  %1319 = vmatprep.subr.bf16.mxu0 %v936_v9  ;;  %2085 = vmatprep.subr.bf16.mxu1 %v936_v9 }
  0xff   : > { %v695_v16 = vadd.f32 %v694_v15, %v368_v13  ;;  %v696_v17 = vpop.f32.mrb[7].mxu0  ;;  %1320 = vmatpush1.bf16.msra.mxu0 %v935_v8  ;;  %2101 = vmatpush1.bf16.msra.mxu1 %v935_v8  ;;  %v843_v19 = vmax.f32 %v691_v11, 0.0  ;;  %v403_v8 = vpop.permute.xlu0 %402 }
 0x100   : > { %v697_v18 = vadd.f32 %v696_v17, %v368_v13  ;;  %v844_v21 = vmax.f32 %v693_v14, 0.0  ;;  %v408_v13 = vpop.permute.xlu1 %407 }
 0x101   : > { %v845_v20 = vmax.f32 %v695_v16, 0.0 }
 0x102   : > { %v846_v22 = vmax.f32 %v697_v18, 0.0 }
 0x103   : > { %v937_v23 = vpack.c.bf16 %v845_v20, %v843_v19 }
 0x104   : > { %v938_v25 = vpack.c.bf16 %v846_v22, %v844_v21  ;;  %v700_v26 = vpop.f32.mrb[8].mxu0 }
 0x105   : > { %v701_v2 = vadd.f32 %v700_v26, %v373_v24  ;;  %v702_v27 = vpop.f32.mrb[9].mxu0 }
 0x106   : > { %v703_v29 = vadd.f32 %v702_v27, %v373_v24  ;;  %v704_v30 = vpop.f32.mrb[10].mxu0  ;;  %1321 = vmatprep.subr.bf16.mxu0 %v938_v25  ;;  %2086 = vmatprep.subr.bf16.mxu1 %v938_v25  ;;  %v413_v24 = vpop.permute.xlu0 %412 }
 0x107   : > { %v705_v31 = vadd.f32 %v704_v30, %v378_v28  ;;  %v706_v32 = vpop.f32.mrb[11].mxu0  ;;  %1322 = vmatpush1.bf16.msra.mxu0 %v937_v23  ;;  %2102 = vmatpush1.bf16.msra.mxu1 %v937_v23  ;;  %v847_v34 = vmax.f32 %v701_v2, 0.0 }
 0x108   : > { %v707_v33 = vadd.f32 %v706_v32, %v378_v28  ;;  %v848_v36 = vmax.f32 %v703_v29, 0.0  ;;  %v418_v28 = vpop.permute.xlu1 %417 }
 0x109   : > { %v849_v35 = vmax.f32 %v705_v31, 0.0 }
 0x10a   : > { %v850_v37 = vmax.f32 %v707_v33, 0.0 }
 0x10b   : > { %v939_v38 = vpack.c.bf16 %v849_v35, %v847_v34 }
 0x10c   : > { %v940_v40 = vpack.c.bf16 %v850_v37, %v848_v36  ;;  %v710_v41 = vpop.f32.mrb[12].mxu0 }
 0x10d   : > { %v711_v42 = vadd.f32 %v710_v41, %v383_v39  ;;  %v712_v43 = vpop.f32.mrb[13].mxu0 }
 0x10e   : > { %v713_v45 = vadd.f32 %v712_v43, %v383_v39  ;;  %v714_v46 = vpop.f32.mrb[14].mxu0  ;;  %1323 = vmatprep.subr.bf16.mxu0 %v940_v40  ;;  %2087 = vmatprep.subr.bf16.mxu1 %v940_v40  ;;  %v423_v39 = vpop.permute.xlu0 %422 }
 0x10f   : > { %v715_v47 = vadd.f32 %v714_v46, %v388_v44  ;;  %v716_v48 = vpop.f32.mrb[15].mxu0  ;;  %1324 = vmatpush1.bf16.msra.mxu0 %v939_v38  ;;  %2103 = vmatpush1.bf16.msra.mxu1 %v939_v38  ;;  %v851_v50 = vmax.f32 %v711_v42, 0.0 }
 0x110   : > { %v717_v49 = vadd.f32 %v716_v48, %v388_v44  ;;  %v852_v52 = vmax.f32 %v713_v45, 0.0  ;;  %v428_v44 = vpop.permute.xlu1 %427 }
 0x111   : > { %v853_v51 = vmax.f32 %v715_v47, 0.0 }
 0x112   : > { %v854_v53 = vmax.f32 %v717_v49, 0.0 }
 0x113   : > { %v941_v54 = vpack.c.bf16 %v853_v51, %v851_v50 }
 0x114   : > { %v942_v56 = vpack.c.bf16 %v854_v53, %v852_v52  ;;  %v720_v57 = vpop.f32.mrb[16].mxu0 }
 0x115   : > { %v721_v58 = vadd.f32 %v720_v57, %v393_v55  ;;  %v722_v59 = vpop.f32.mrb[17].mxu0 }
 0x116   : > { %v723_v61 = vadd.f32 %v722_v59, %v393_v55  ;;  %v724_v62 = vpop.f32.mrb[18].mxu0  ;;  %1325 = vmatprep.subr.bf16.mxu0 %v942_v56  ;;  %2088 = vmatprep.subr.bf16.mxu1 %v942_v56  ;;  %v433_v55 = vpop.permute.xlu0 %432 }
 0x117   : > { %v725_v63 = vadd.f32 %v724_v62, %v398_v60  ;;  %v726_v0 = vpop.f32.mrb[19].mxu0  ;;  %1326 = vmatpush1.bf16.msra.mxu0 %v941_v54  ;;  %2104 = vmatpush1.bf16.msra.mxu1 %v941_v54  ;;  %v855_v3 = vmax.f32 %v721_v58, 0.0 }
 0x118   : > { %v727_v1 = vadd.f32 %v726_v0, %v398_v60  ;;  %v856_v5 = vmax.f32 %v723_v61, 0.0  ;;  %v438_v60 = vpop.permute.xlu1 %437 }
 0x119   : > { %v857_v4 = vmax.f32 %v725_v63, 0.0 }
 0x11a   : > { %v858_v6 = vmax.f32 %v727_v1, 0.0 }
 0x11b   : > { %v943_v7 = vpack.c.bf16 %v857_v4, %v855_v3 }
 0x11c   : > { %v944_v9 = vpack.c.bf16 %v858_v6, %v856_v5  ;;  %v730_v10 = vpop.f32.mrb[20].mxu0 }
 0x11d   : > { %v731_v11 = vadd.f32 %v730_v10, %v403_v8  ;;  %v732_v12 = vpop.f32.mrb[21].mxu0 }
 0x11e   : > { %v733_v14 = vadd.f32 %v732_v12, %v403_v8  ;;  %v734_v15 = vpop.f32.mrb[22].mxu0  ;;  %1327 = vmatprep.subr.bf16.mxu0 %v944_v9  ;;  %2089 = vmatprep.subr.bf16.mxu1 %v944_v9  ;;  %v443_v8 = vpop.permute.xlu0 %442 }
 0x11f   : > { %v735_v16 = vadd.f32 %v734_v15, %v408_v13  ;;  %v736_v17 = vpop.f32.mrb[23].mxu0  ;;  %1328 = vmatpush1.bf16.msra.mxu0 %v943_v7  ;;  %2105 = vmatpush1.bf16.msra.mxu1 %v943_v7  ;;  %v859_v19 = vmax.f32 %v731_v11, 0.0 }
 0x120   : > { %v737_v18 = vadd.f32 %v736_v17, %v408_v13  ;;  %v860_v21 = vmax.f32 %v733_v14, 0.0  ;;  %v448_v13 = vpop.permute.xlu1 %447 }
 0x121   : > { %v861_v20 = vmax.f32 %v735_v16, 0.0 }
 0x122   : > { %v862_v22 = vmax.f32 %v737_v18, 0.0 }
 0x123   : > { %v945_v23 = vpack.c.bf16 %v861_v20, %v859_v19 }
 0x124   : > { %v946_v25 = vpack.c.bf16 %v862_v22, %v860_v21  ;;  %v740_v26 = vpop.f32.mrb[24].mxu0 }
 0x125   : > { %v741_v2 = vadd.f32 %v740_v26, %v413_v24  ;;  %v742_v27 = vpop.f32.mrb[25].mxu0 }
 0x126   : > { %v743_v29 = vadd.f32 %v742_v27, %v413_v24  ;;  %v744_v30 = vpop.f32.mrb[26].mxu0  ;;  %1329 = vmatprep.subr.bf16.mxu0 %v946_v25  ;;  %2090 = vmatprep.subr.bf16.mxu1 %v946_v25  ;;  %v453_v24 = vpop.permute.xlu0 %452 }
 0x127   : > { %v745_v31 = vadd.f32 %v744_v30, %v418_v28  ;;  %v746_v32 = vpop.f32.mrb[27].mxu0  ;;  %1330 = vmatpush1.bf16.msra.mxu0 %v945_v23  ;;  %2106 = vmatpush1.bf16.msra.mxu1 %v945_v23  ;;  %v863_v34 = vmax.f32 %v741_v2, 0.0 }
 0x128   : > { %v747_v33 = vadd.f32 %v746_v32, %v418_v28  ;;  %v864_v36 = vmax.f32 %v743_v29, 0.0  ;;  %v458_v28 = vpop.permute.xlu1 %457 }
 0x129   : > { %v865_v35 = vmax.f32 %v745_v31, 0.0 }
 0x12a   : > { %v866_v37 = vmax.f32 %v747_v33, 0.0 }
 0x12b   : > { %v947_v38 = vpack.c.bf16 %v865_v35, %v863_v34 }
 0x12c   : > { %v948_v40 = vpack.c.bf16 %v866_v37, %v864_v36  ;;  %v750_v41 = vpop.f32.mrb[28].mxu0 }
 0x12d   : > { %v751_v42 = vadd.f32 %v750_v41, %v423_v39  ;;  %v752_v43 = vpop.f32.mrb[29].mxu0 }
 0x12e   : > { %v753_v45 = vadd.f32 %v752_v43, %v423_v39  ;;  %v754_v46 = vpop.f32.mrb[30].mxu0  ;;  %1331 = vmatprep.subr.bf16.mxu0 %v948_v40  ;;  %2091 = vmatprep.subr.bf16.mxu1 %v948_v40  ;;  %v463_v39 = vpop.permute.xlu0 %462 }
 0x12f   : > { %v755_v47 = vadd.f32 %v754_v46, %v428_v44  ;;  %v756_v48 = vpop.f32.mrb[31].mxu0  ;;  %1332 = vmatpush1.bf16.msra.mxu0 %v947_v38  ;;  %2107 = vmatpush1.bf16.msra.mxu1 %v947_v38  ;;  %v867_v50 = vmax.f32 %v751_v42, 0.0 }
 0x130   : > { %v757_v49 = vadd.f32 %v756_v48, %v428_v44  ;;  %v868_v52 = vmax.f32 %v753_v45, 0.0  ;;  %v468_v44 = vpop.permute.xlu1 %467 }
 0x131   : > { %v869_v51 = vmax.f32 %v755_v47, 0.0 }
 0x132   : > { %v870_v53 = vmax.f32 %v757_v49, 0.0 }
 0x133   : > { %v949_v54 = vpack.c.bf16 %v869_v51, %v867_v50 }
 0x134   : > { %v950_v56 = vpack.c.bf16 %v870_v53, %v868_v52  ;;  %v760_v57 = vpop.f32.mrb[32].mxu0 }
 0x135   : > { %v761_v58 = vadd.f32 %v760_v57, %v433_v55  ;;  %v762_v59 = vpop.f32.mrb[33].mxu0 }
 0x136   : > { %v763_v61 = vadd.f32 %v762_v59, %v433_v55  ;;  %v764_v62 = vpop.f32.mrb[34].mxu0  ;;  %1333 = vmatprep.subr.bf16.mxu0 %v950_v56  ;;  %2092 = vmatprep.subr.bf16.mxu1 %v950_v56  ;;  %v473_v55 = vpop.permute.xlu0 %472 }
 0x137   : > { %v765_v63 = vadd.f32 %v764_v62, %v438_v60  ;;  %v766_v0 = vpop.f32.mrb[35].mxu0  ;;  %1334 = vmatpush1.bf16.msra.mxu0 %v949_v54  ;;  %2108 = vmatpush1.bf16.msra.mxu1 %v949_v54  ;;  %v871_v3 = vmax.f32 %v761_v58, 0.0 }
 0x138   : > { %v767_v1 = vadd.f32 %v766_v0, %v438_v60  ;;  %v872_v5 = vmax.f32 %v763_v61, 0.0  ;;  %v478_v60 = vpop.permute.xlu1 %477 }
 0x139   : > { %v873_v4 = vmax.f32 %v765_v63, 0.0 }
 0x13a   : > { %v874_v6 = vmax.f32 %v767_v1, 0.0 }
 0x13b   : > { %v951_v7 = vpack.c.bf16 %v873_v4, %v871_v3 }
 0x13c   : > { %v952_v9 = vpack.c.bf16 %v874_v6, %v872_v5  ;;  %v770_v10 = vpop.f32.mrb[36].mxu0 }
 0x13d   : > { %v771_v11 = vadd.f32 %v770_v10, %v443_v8  ;;  %v772_v12 = vpop.f32.mrb[37].mxu0 }
 0x13e   : > { %v773_v14 = vadd.f32 %v772_v12, %v443_v8  ;;  %v774_v15 = vpop.f32.mrb[38].mxu0  ;;  %1335 = vmatprep.subr.bf16.mxu0 %v952_v9  ;;  %2093 = vmatprep.subr.bf16.mxu1 %v952_v9  ;;  %v483_v8 = vpop.permute.xlu0 %482 }
 0x13f   : > { %v775_v16 = vadd.f32 %v774_v15, %v448_v13  ;;  %v776_v17 = vpop.f32.mrb[39].mxu0  ;;  %1336 = vmatpush1.bf16.msra.mxu0 %v951_v7  ;;  %2109 = vmatpush1.bf16.msra.mxu1 %v951_v7  ;;  %v875_v19 = vmax.f32 %v771_v11, 0.0 }
 0x140   : > { %v777_v18 = vadd.f32 %v776_v17, %v448_v13  ;;  %v876_v21 = vmax.f32 %v773_v14, 0.0  ;;  %v488_v13 = vpop.permute.xlu1 %487 }
 0x141   : > { %v877_v20 = vmax.f32 %v775_v16, 0.0 }
 0x142   : > { %v878_v22 = vmax.f32 %v777_v18, 0.0 }
 0x143   : > { %v953_v23 = vpack.c.bf16 %v877_v20, %v875_v19 }
 0x144   : > { %v954_v25 = vpack.c.bf16 %v878_v22, %v876_v21  ;;  %v780_v26 = vpop.f32.mrb[40].mxu0 }
 0x145   : > { %v781_v2 = vadd.f32 %v780_v26, %v453_v24  ;;  %v782_v27 = vpop.f32.mrb[41].mxu0 }
 0x146   : > { %v783_v29 = vadd.f32 %v782_v27, %v453_v24  ;;  %v784_v30 = vpop.f32.mrb[42].mxu0  ;;  %1337 = vmatprep.subr.bf16.mxu0 %v954_v25  ;;  %2094 = vmatprep.subr.bf16.mxu1 %v954_v25  ;;  %v493_v24 = vpop.permute.xlu0 %492 }
 0x147   : > { %v785_v31 = vadd.f32 %v784_v30, %v458_v28  ;;  %v786_v32 = vpop.f32.mrb[43].mxu0  ;;  %1338 = vmatpush1.bf16.msra.mxu0 %v953_v23  ;;  %2110 = vmatpush1.bf16.msra.mxu1 %v953_v23  ;;  %v879_v34 = vmax.f32 %v781_v2, 0.0 }
 0x148   : > { %v787_v33 = vadd.f32 %v786_v32, %v458_v28  ;;  %v880_v36 = vmax.f32 %v783_v29, 0.0  ;;  %v498_v28 = vpop.permute.xlu1 %497 }
 0x149   : > { %v881_v35 = vmax.f32 %v785_v31, 0.0 }
 0x14a   : > { %v882_v37 = vmax.f32 %v787_v33, 0.0 }
 0x14b   : > { %v955_v38 = vpack.c.bf16 %v881_v35, %v879_v34 }
 0x14c   : > { %v956_v40 = vpack.c.bf16 %v882_v37, %v880_v36  ;;  %v790_v41 = vpop.f32.mrb[44].mxu0 }
 0x14d   : > { %v791_v42 = vadd.f32 %v790_v41, %v463_v39  ;;  %v792_v43 = vpop.f32.mrb[45].mxu0 }
 0x14e   : > { %v793_v45 = vadd.f32 %v792_v43, %v463_v39  ;;  %v794_v46 = vpop.f32.mrb[46].mxu0  ;;  %1339 = vmatprep.subr.bf16.mxu0 %v956_v40  ;;  %2095 = vmatprep.subr.bf16.mxu1 %v956_v40  ;;  %v503_v39 = vpop.permute.xlu0 %502 }
 0x14f   : > { %v795_v47 = vadd.f32 %v794_v46, %v468_v44  ;;  %v796_v48 = vpop.f32.mrb[47].mxu0  ;;  %1340 = vmatpush1.bf16.msra.mxu0 %v955_v38  ;;  %2111 = vmatpush1.bf16.msra.mxu1 %v955_v38  ;;  %v883_v50 = vmax.f32 %v791_v42, 0.0 }
 0x150   : > { %v797_v49 = vadd.f32 %v796_v48, %v468_v44  ;;  %v884_v52 = vmax.f32 %v793_v45, 0.0  ;;  %v508_v44 = vpop.permute.xlu1 %507 }
 0x151   : > { %v885_v51 = vmax.f32 %v795_v47, 0.0 }
 0x152   : > { %v886_v53 = vmax.f32 %v797_v49, 0.0 }
 0x153   : > { %v957_v54 = vpack.c.bf16 %v885_v51, %v883_v50 }
 0x154   : > { %v958_v56 = vpack.c.bf16 %v886_v53, %v884_v52  ;;  %v800_v57 = vpop.f32.mrb[48].mxu0 }
 0x155   : > { %v801_v58 = vadd.f32 %v800_v57, %v473_v55  ;;  %v802_v59 = vpop.f32.mrb[49].mxu0  ;;  %v2179_v57 = vld [vmem:[%s3018_s3 + $0x30] ss:$8 sps:$4 sm:$0xff]  }
 0x156   : > { %v803_v61 = vadd.f32 %v802_v59, %v473_v55  ;;  %v804_v62 = vpop.f32.mrb[50].mxu0  ;;  %1341 = vmatprep.subr.bf16.mxu0 %v958_v56  ;;  %2096 = vmatprep.subr.bf16.mxu1 %v958_v56  ;;  %v2176_v56 = vld [vmem:[%s3018_s3] ss:$8 sps:$4 sm:$0xff]   ;;  %v2184_v59 = vld [vmem:[%s3018_s3 + $0x44] ss:$8 sps:$4 sm:$0xff]  }
 0x157   : > { %v805_v63 = vadd.f32 %v804_v62, %v478_v60  ;;  %v806_v0 = vpop.f32.mrb[51].mxu0  ;;  %1342 = vmatpush1.bf16.msra.mxu0 %v957_v54  ;;  %2112 = vmatpush1.bf16.msra.mxu1 %v957_v54  ;;  %v887_v3 = vmax.f32 %v801_v58, 0.0  ;;  %v2182_v58 = vld [vmem:[%s3018_s3 + $0x14] ss:$8 sps:$4 sm:$0xff]   ;;  %v2188_v62 = vld [vmem:[%s3018_s3 + $0x24] ss:$8 sps:$4 sm:$0xff]  }
 0x158   : > { %v807_v1 = vadd.f32 %v806_v0, %v478_v60  ;;  %v888_v5 = vmax.f32 %v803_v61, 0.0  ;;  %v2186_v60 = vld [vmem:[%s3018_s3 + $0x10] ss:$8 sps:$4 sm:$0xff]   ;;  %v2187_v61 = vld [vmem:[%s3018_s3 + $0x40] ss:$8 sps:$4 sm:$0xff]  }
 0x159   : > { %v889_v4 = vmax.f32 %v805_v63, 0.0  ;;  %v2190_v63 = vld [vmem:[%s3018_s3 + $0x54] ss:$8 sps:$4 sm:$0xff]   ;;  %v2192_v0 = vld [vmem:[%s3018_s3 + $0x20] ss:$8 sps:$4 sm:$0xff]  }
 0x15a   : > { %v890_v6 = vmax.f32 %v807_v1, 0.0  ;;  %v2193_v1 = vld [vmem:[%s3018_s3 + $0x50] ss:$8 sps:$4 sm:$0xff]  }
 0x15b   : > { %v959_v7 = vpack.c.bf16 %v889_v4, %v887_v3  ;;  %v2194_v3 = vld [vmem:[%s3018_s3 + $0x64] ss:$8 sps:$4 sm:$0xff]   ;;  %v2196_v4 = vld [vmem:[%s3018_s3 + $0x60] ss:$8 sps:$4 sm:$0xff]  }
 0x15c   : > { %v960_v9 = vpack.c.bf16 %v890_v6, %v888_v5  ;;  %v810_v10 = vpop.f32.mrb[52].mxu0  ;;  %v2197_v5 = vld [vmem:[%s3018_s3 + $0x74] ss:$8 sps:$4 sm:$0xff]   ;;  %v2199_v6 = vld [vmem:[%s3018_s3 + $0x70] ss:$8 sps:$4 sm:$0xff]  }
 0x15d   : > { %v811_v11 = vadd.f32 %v810_v10, %v483_v8  ;;  %v812_v12 = vpop.f32.mrb[53].mxu0  ;;  %v2205_v10 = vld [vmem:[%s3018_s3 + $0x90] ss:$8 sps:$4 sm:$0xff]  }
 0x15e   : > { %v813_v14 = vadd.f32 %v812_v12, %v483_v8  ;;  %v814_v15 = vpop.f32.mrb[54].mxu0  ;;  %1343 = vmatprep.subr.bf16.mxu0 %v960_v9  ;;  %2097 = vmatprep.subr.bf16.mxu1 %v960_v9  ;;  %v2202_v8 = vld [vmem:[%s3018_s3 + $0x80] ss:$8 sps:$4 sm:$0xff]   ;;  %v2203_v9 = vld [vmem:[%s3018_s3 + $0x94] ss:$8 sps:$4 sm:$0xff]  }
 0x15f   : > { %v815_v16 = vadd.f32 %v814_v15, %v488_v13  ;;  %v816_v17 = vpop.f32.mrb[55].mxu0  ;;  %1344 = vmatpush1.bf16.msra.mxu0 %v959_v7  ;;  %2113 = vmatpush1.bf16.msra.mxu1 %v959_v7  ;;  %v891_v19 = vmax.f32 %v811_v11, 0.0  ;;  %v2200_v7 = vld [vmem:[%s3018_s3 + $0x84] ss:$8 sps:$4 sm:$0xff]   ;;  %v2208_v12 = vld [vmem:[%s3018_s3 + $0xa0] ss:$8 sps:$4 sm:$0xff]  }
 0x160   : > { %v817_v18 = vadd.f32 %v816_v17, %v488_v13  ;;  %v892_v21 = vmax.f32 %v813_v14, 0.0  ;;  %v2206_v11 = vld [vmem:[%s3018_s3 + $0xa4] ss:$8 sps:$4 sm:$0xff]   ;;  %v2209_v13 = vld [vmem:[%s3018_s3 + $0xb4] ss:$8 sps:$4 sm:$0xff]  }
 0x161   : > { %v893_v20 = vmax.f32 %v815_v16, 0.0  ;;  %v2211_v14 = vld [vmem:[%s3018_s3 + $0xb0] ss:$8 sps:$4 sm:$0xff]   ;;  %v2212_v15 = vld [vmem:[%s3018_s3 + $0xc4] ss:$8 sps:$4 sm:$0xff]  }
 0x162   : > { %v894_v22 = vmax.f32 %v817_v18, 0.0  ;;  %v2214_v16 = vld [vmem:[%s3018_s3 + $0xc0] ss:$8 sps:$4 sm:$0xff]   ;;  %v2215_v17 = vld [vmem:[%s3018_s3 + $0xd4] ss:$8 sps:$4 sm:$0xff]  }
 0x163   : > { %v961_v23 = vpack.c.bf16 %v893_v20, %v891_v19  ;;  %v2217_v18 = vld [vmem:[%s3018_s3 + $0xd0] ss:$8 sps:$4 sm:$0xff]   ;;  %v2218_v19 = vld [vmem:[%s3018_s3 + $0xe4] ss:$8 sps:$4 sm:$0xff]   ;;  %v2220_v20 = vld [vmem:[%s3018_s3 + $0xe0] ss:$8 sps:$4 sm:$0xff]  }
 0x164   : > { %v962_v25 = vpack.c.bf16 %v894_v22, %v892_v21  ;;  %v820_v26 = vpop.f32.mrb[56].mxu0  ;;  %v2221_v21 = vld [vmem:[%s3018_s3 + $0xf4] ss:$8 sps:$4 sm:$0xff]   ;;  %v2223_v22 = vld [vmem:[%s3018_s3 + $0xf0] ss:$8 sps:$4 sm:$0xff]  }
 0x165   : > { %v821_v2 = vadd.f32 %v820_v26, %v493_v24  ;;  %v822_v27 = vpop.f32.mrb[57].mxu0 }
 0x166   : > { %v823_v29 = vadd.f32 %v822_v27, %v493_v24  ;;  %v824_v30 = vpop.f32.mrb[58].mxu0  ;;  %1345 = vmatprep.subr.bf16.mxu0 %v962_v25  ;;  %2098 = vmatprep.subr.bf16.mxu1 %v962_v25  ;;  %v1002_v24 = vpop.permute.xlu0 %1001 }
 0x167   : > { %v825_v31 = vadd.f32 %v824_v30, %v498_v28  ;;  %v826_v32 = vpop.f32.mrb[59].mxu0  ;;  %1346 = vmatpush1.bf16.msra.mxu0 %v961_v23  ;;  %2114 = vmatpush1.bf16.msra.mxu1 %v961_v23  ;;  %v895_v34 = vmax.f32 %v821_v2, 0.0  ;;  %v1007_v23 = vpop.permute.xlu1 %1006 }
 0x168   : > { %v827_v33 = vadd.f32 %v826_v32, %v498_v28  ;;  %v896_v36 = vmax.f32 %v823_v29, 0.0 }
 0x169   : > { %v897_v35 = vmax.f32 %v825_v31, 0.0 }
 0x16a   : > { %v898_v37 = vmax.f32 %v827_v33, 0.0  ;;  %v1012_v26 = vpop.permute.xlu0 %1011 }
 0x16b   : > { %v963_v38 = vpack.c.bf16 %v897_v35, %v895_v34  ;;  %v2852_v25 = vpop.permute.xlu1 %1016 }
 0x16c   : > { %v964_v40 = vpack.c.bf16 %v898_v37, %v896_v36  ;;  %v830_v41 = vpop.f32.mrb[60].mxu0 }
 0x16d   : > { %v831_v42 = vadd.f32 %v830_v41, %v503_v39  ;;  %v832_v43 = vpop.f32.mrb[61].mxu0 }
 0x16e   : > { %v833_v45 = vadd.f32 %v832_v43, %v503_v39  ;;  %v834_v46 = vpop.f32.mrb[62].mxu0  ;;  %1347 = vmatprep.subr.bf16.mxu0 %v964_v40  ;;  %2099 = vmatprep.subr.bf16.mxu1 %v964_v40  ;;  %v2856_v27 = vpop.permute.xlu0 %1021 }
 0x16f   : > { %v835_v47 = vadd.f32 %v834_v46, %v508_v44  ;;  %v836_v48 = vpop.f32.mrb[63].mxu0  ;;  %1348 = vmatpush1.bf16.msra.mxu0 %v963_v38  ;;  %2115 = vmatpush1.bf16.msra.mxu1 %v963_v38  ;;  %v899_v50 = vmax.f32 %v831_v42, 0.0  ;;  %v2854_v2 = vpop.permute.xlu1 %1026 }
 0x170   : > { %v837_v49 = vadd.f32 %v836_v48, %v508_v44  ;;  %v900_v52 = vmax.f32 %v833_v45, 0.0 }
 0x171   : > { %v901_v51 = vmax.f32 %v835_v47, 0.0 }
 0x172   : > { %v902_v53 = vmax.f32 %v837_v49, 0.0  ;;  %v2860_v29 = vpop.permute.xlu0 %1031 }
 0x173   : > { %v965_v54 = vpack.c.bf16 %v901_v51, %v899_v50  ;;  %v2858_v28 = vpop.permute.xlu1 %1036 }
 0x174   : > { %v966_v55 = vpack.c.bf16 %v902_v53, %v900_v52 }
 0x176   : > { %1349 = vmatprep.subr.bf16.mxu0 %v966_v55  ;;  %2100 = vmatprep.subr.bf16.mxu1 %v966_v55  ;;  %v2864_v31 = vpop.permute.xlu0 %1041 }
 0x177   : > { %1350 = vmatpush1.bf16.msra.mxu0 %v965_v54  ;;  %2116 = vmatpush1.bf16.msra.mxu1 %v965_v54  ;;  %v2862_v30 = vpop.permute.xlu1 %1046 }
 0x17a   : > { %1352 = vmatmul.mubr.bf16.vlgmr.msra.gmra.mrb[64].mxu0 %v2176_v56  ;;  %1382 = vmatmul.mubr.bf16.vlgmr.msra.gmra.mrb[0].mxu1 %v2179_v57  ;;  %v2868_v33 = vpop.permute.xlu0 %1051 }
 0x17b   : > { %1361 = vmatprep.mubr.bf16.mxu0 %v2182_v58  ;;  %1391 = vmatprep.mubr.bf16.mxu1 %v2184_v59  ;;  %v2866_v32 = vpop.permute.xlu1 %1056 }
 0x17e   : > { %v2872_v35 = vpop.permute.xlu0 %1061 }
 0x17f   : > { %v2870_v34 = vpop.permute.xlu1 %1066 }
 0x182   : > { %1362 = vmatmul.mubr.bf16.gmra.mrb[68].mxu0 %v2186_v60  ;;  %1392 = vmatmul.mubr.bf16.gmra.mrb[4].mxu1 %v2187_v61  ;;  %v2876_v37 = vpop.permute.xlu0 %1071 }
 0x183   : > { %1371 = vmatprep.mubr.bf16.mxu0 %v2188_v62  ;;  %1401 = vmatprep.mubr.bf16.mxu1 %v2190_v63  ;;  %v2874_v36 = vpop.permute.xlu1 %1076 }
 0x186   : > { %v2880_v39 = vpop.permute.xlu0 %1081 }
 0x187   : > { %v2878_v38 = vpop.permute.xlu1 %1086 }
 0x18a   : > { %1372 = vmatmul.mubr.bf16.gmra.mrb[72].mxu0 %v2192_v0  ;;  %1402 = vmatmul.mubr.bf16.gmra.mrb[8].mxu1 %v2193_v1  ;;  %v2884_v41 = vpop.permute.xlu0 %1091 }
 0x18b   : > { %1411 = vmatprep.mubr.bf16.mxu1 %v2194_v3  ;;  %v2882_v40 = vpop.permute.xlu1 %1096 }
 0x18e   : > { %v2888_v43 = vpop.permute.xlu0 %1101 }
 0x18f   : > { %v2886_v42 = vpop.permute.xlu1 %1106 }
 0x192   : > { %1412 = vmatmul.mubr.bf16.gmra.mrb[12].mxu1 %v2196_v4  ;;  %v2892_v45 = vpop.permute.xlu0 %1111 }
 0x193   : > { %1421 = vmatprep.mubr.bf16.mxu1 %v2197_v5  ;;  %v2890_v44 = vpop.permute.xlu1 %1116 }
 0x196   : > { %v2896_v47 = vpop.permute.xlu0 %1121 }
 0x197   : > { %v2894_v46 = vpop.permute.xlu1 %1126 }
 0x19a   : > { %1422 = vmatmul.mubr.bf16.gmra.mrb[16].mxu1 %v2199_v6  ;;  %v2898_v49 = vpop.permute.xlu0 %1131 }
 0x19b   : > { %1431 = vmatprep.mubr.bf16.mxu1 %v2200_v7  ;;  %v1611_v48 = vpop.permute.xlu1 %1610 }
 0x19e   : > { %v1616_v51 = vpop.permute.xlu0 %1615 }
 0x19f   : > { %v1621_v50 = vpop.permute.xlu1 %1620 }
 0x1a2   : > { %1432 = vmatmul.mubr.bf16.gmra.mrb[20].mxu1 %v2202_v8  ;;  %v1626_v53 = vpop.permute.xlu0 %1625 }
 0x1a3   : > { %1441 = vmatprep.mubr.bf16.mxu1 %v2203_v9  ;;  %v2900_v52 = vpop.permute.xlu1 %1630 }
 0x1a6   : > { %v2904_v8 = vpop.permute.xlu0 %1635 }
 0x1a7   : > { %v2902_v7 = vpop.permute.xlu1 %1640 }
 0x1aa   : > { %1442 = vmatmul.mubr.bf16.gmra.mrb[24].mxu1 %v2205_v10 }
 0x1ab   : > { %1451 = vmatprep.mubr.bf16.mxu1 %v2206_v11 }
 0x1b2   : > { %1452 = vmatmul.mubr.bf16.gmra.mrb[28].mxu1 %v2208_v12 }
 0x1b3   : > { %1461 = vmatprep.mubr.bf16.mxu1 %v2209_v13 }
 0x1ba   : > { %1462 = vmatmul.mubr.bf16.gmra.mrb[32].mxu1 %v2211_v14 }
 0x1bb   : > { %1471 = vmatprep.mubr.bf16.mxu1 %v2212_v15 }
 0x1c2   : > { %1472 = vmatmul.mubr.bf16.gmra.mrb[36].mxu1 %v2214_v16 }
 0x1c3   : > { %1481 = vmatprep.mubr.bf16.mxu1 %v2215_v17 }
 0x1ca   : > { %1482 = vmatmul.mubr.bf16.gmra.mrb[40].mxu1 %v2217_v18 }
 0x1cb   : > { %1491 = vmatprep.mubr.bf16.mxu1 %v2218_v19 }
 0x1d2   : > { %1492 = vmatmul.mubr.bf16.gmra.mrb[44].mxu1 %v2220_v20 }
 0x1d3   : > { %1501 = vmatprep.mubr.bf16.mxu1 %v2221_v21 }
 0x1da   : > { %1502 = vmatmul.mubr.bf16.gmra.mrb[48].mxu1 %v2223_v22 }
 0x24d   : > { %v1353_v54 = vpop.f32.mrb[64].mxu0  ;;  %v1383_v55 = vpop.f32.mrb[0].mxu1 }
 0x24e   : > { %v1354_v56 = vadd.f32 %v1353_v54, %v1002_v24  ;;  %v1355_v57 = vpop.f32.mrb[65].mxu0  ;;  %v1385_v58 = vpop.f32.mrb[1].mxu1 }
 0x24f   : > { %v1356_v59 = vadd.f32 %v1355_v57, %v1002_v24  ;;  %v1357_v60 = vpop.f32.mrb[66].mxu0  ;;  %v1387_v61 = vpop.f32.mrb[2].mxu1 }
 0x250   : > { %v1512_v62 = vmax.f32 %v1354_v56, 0.0  ;;  %v1358_v63 = vadd.f32 %v1357_v60, %v1007_v23  ;;  %v1359_v0 = vpop.f32.mrb[67].mxu0  ;;  %v1389_v1 = vpop.f32.mrb[3].mxu1 }
 0x251   : > { %v1513_v3 = vmax.f32 %v1356_v59, 0.0  ;;  %v1360_v4 = vadd.f32 %v1359_v0, %v1007_v23  ;;  %v1646_v0 = vpop.permute.xlu0 %1645 }
 0x252   : > { %v1514_v5 = vmax.f32 %v1358_v63, 0.0  ;;  %v1768_v9 = vmul.f32 %v1611_v48, %v1512_v62  ;;  %v2908_v63 = vpop.permute.xlu1 %1650 }
 0x253   : > { %v1515_v6 = vmax.f32 %v1360_v4, 0.0  ;;  %v1769_v11 = vmul.f32 %v1611_v48, %v1513_v3 }
 0x254   : > { %v1770_v10 = vmul.f32 %v1616_v51, %v1514_v5 }
 0x255   : > { %v1771_v12 = vmul.f32 %v1616_v51, %v1515_v6  ;;  %v1363_v13 = vpop.f32.mrb[68].mxu0  ;;  %v1393_v14 = vpop.f32.mrb[4].mxu1 }
 0x256   : > { %v1832_v15 = vadd.f32 %v1770_v10, %v1768_v9  ;;  %v1364_v16 = vadd.f32 %v1363_v13, %v1012_v26  ;;  %v1365_v17 = vpop.f32.mrb[69].mxu0  ;;  %v1395_v18 = vpop.f32.mrb[5].mxu1  ;;  %v1384_v10 = vadd.f32 %v1383_v55, %v2860_v29  ;;  %v1390_v55 = vadd.f32 %v1389_v1, %v2858_v28 }
 0x257   : > { %v1869_v19 = vadd.f32 %v1771_v12, %v1769_v11  ;;  %v1366_v20 = vadd.f32 %v1365_v17, %v1012_v26  ;;  %v1367_v21 = vpop.f32.mrb[70].mxu0  ;;  %v1397_v22 = vpop.f32.mrb[6].mxu1 }
 0x258   : > { %v1516_v23 = vmax.f32 %v1364_v16, 0.0  ;;  %v1368_v24 = vadd.f32 %v1367_v21, %v2852_v25  ;;  %v1369_v54 = vpop.f32.mrb[71].mxu0  ;;  %v1399_v56 = vpop.f32.mrb[7].mxu1  ;;  %v1386_v16 = vadd.f32 %v1385_v58, %v2860_v29  ;;  %v1524_v29 = vmax.f32 %v1384_v10, 0.0 }
 0x259   : > { %v1517_v57 = vmax.f32 %v1366_v20, 0.0  ;;  %v1370_v59 = vadd.f32 %v1369_v54, %v2852_v25  ;;  %v1394_v58 = vadd.f32 %v1393_v14, %v2864_v31 }
 0x25a   : > { %v1772_v48 = vmul.f32 %v1621_v50, %v1516_v23  ;;  %v1518_v51 = vmax.f32 %v1368_v24, 0.0 }
 0x25b   : > { %v1773_v60 = vmul.f32 %v1621_v50, %v1517_v57  ;;  %v1519_v62 = vmax.f32 %v1370_v59, 0.0  ;;  %v2918_v59 = vpop.permute.xlu1 %1660 }
 0x25c   : > { %v1833_v3 = vadd.f32 %v1832_v15, %v1772_v48  ;;  %v1774_v4 = vmul.f32 %v1626_v53, %v1518_v51  ;;  %v1388_v15 = vadd.f32 %v1387_v61, %v2858_v28  ;;  %v1656_v51 = vpop.permute.xlu0 %1655  ;;  %v1525_v61 = vmax.f32 %v1386_v16, 0.0 }
 0x25d   : > { %v1870_v26 = vadd.f32 %v1869_v19, %v1773_v60  ;;  %v1775_v5 = vmul.f32 %v1626_v53, %v1519_v62  ;;  %v1373_v6 = vpop.f32.mrb[72].mxu0  ;;  %v1403_v9 = vpop.f32.mrb[8].mxu1  ;;  %v1396_v60 = vadd.f32 %v1395_v18, %v2864_v31  ;;  %v1398_v28 = vadd.f32 %v1397_v22, %v2862_v30 }
 0x25e   : > { %v1834_v11 = vadd.f32 %v1833_v3, %v1774_v4  ;;  %v1374_v12 = vadd.f32 %v1373_v6, %v2856_v27  ;;  %v1375_v13 = vpop.f32.mrb[73].mxu0  ;;  %v1405_v25 = vpop.f32.mrb[9].mxu1  ;;  %v1526_v4 = vmax.f32 %v1388_v15, 0.0  ;;  %v1404_v31 = vadd.f32 %v1403_v9, %v2868_v33 }
 0x25f   : > { %v1871_v50 = vadd.f32 %v1870_v26, %v1775_v5  ;;  %v1376_v17 = vadd.f32 %v1375_v13, %v2856_v27  ;;  %v1377_v20 = vpop.f32.mrb[74].mxu0  ;;  %v1407_v21 = vpop.f32.mrb[10].mxu1  ;;  %v1527_v26 = vmax.f32 %v1390_v55, 0.0  ;;  %v1400_v5 = vadd.f32 %v1399_v56, %v2862_v30 }
 0x260   : > { %v1520_v19 = vmax.f32 %v1374_v12, 0.0  ;;  %v1378_v53 = vadd.f32 %v1377_v20, %v2854_v2  ;;  %v1379_v23 = vpop.f32.mrb[75].mxu0  ;;  %v1409_v24 = vpop.f32.mrb[11].mxu1  ;;  %v1780_v12 = vmul.f32 %v2902_v7, %v1524_v29  ;;  %v1528_v13 = vmax.f32 %v1394_v58, 0.0 }
 0x261   : > { %v1521_v54 = vmax.f32 %v1376_v17, 0.0  ;;  %v1380_v57 = vadd.f32 %v1379_v23, %v2854_v2  ;;  %v1781_v16 = vmul.f32 %v2902_v7, %v1525_v61  ;;  %v1529_v22 = vmax.f32 %v1396_v60, 0.0  ;;  %v1671_v15 = vpop.permute.xlu1 %1670 }
 0x262   : > { %v1776_v27 = vmul.f32 %v2900_v52, %v1520_v19  ;;  %v1522_v48 = vmax.f32 %v1378_v53, 0.0  ;;  %v1782_v30 = vmul.f32 %v1646_v0, %v1526_v4  ;;  %v1530_v56 = vmax.f32 %v1398_v28, 0.0  ;;  %v1666_v53 = vpop.permute.xlu0 %1665 }
 0x263   : > { %v1777_v62 = vmul.f32 %v2900_v52, %v1521_v54  ;;  %v1523_v3 = vmax.f32 %v1380_v57, 0.0  ;;  %v1783_v23 = vmul.f32 %v1646_v0, %v1527_v26  ;;  %v1531_v55 = vmax.f32 %v1400_v5, 0.0 }
 0x264   : > { %v1835_v1 = vadd.f32 %v1834_v11, %v1776_v27  ;;  %v1778_v2 = vmul.f32 %v2904_v8, %v1522_v48  ;;  %v1406_v11 = vadd.f32 %v1405_v25, %v2868_v33  ;;  %v1410_v54 = vadd.f32 %v1409_v24, %v2866_v32 }
 0x265   : > { %v1872_v14 = vadd.f32 %v1871_v50, %v1777_v62  ;;  %v1779_v6 = vmul.f32 %v2904_v8, %v1523_v3  ;;  %v1413_v10 = vpop.f32.mrb[12].mxu1  ;;  %v1408_v8 = vadd.f32 %v1407_v21, %v2866_v32  ;;  %v1784_v7 = vmul.f32 %v2908_v63, %v1528_v13  ;;  %v1681_v28 = vpop.permute.xlu1 %1680 }
 0x266   : > { %v1836_v52 = vadd.f32 %v1835_v1, %v1778_v2  ;;  %v1415_v18 = vpop.f32.mrb[13].mxu1  ;;  %v1532_v57 = vmax.f32 %v1404_v31, 0.0  ;;  %v1414_v33 = vadd.f32 %v1413_v10, %v2872_v35  ;;  %v1785_v25 = vmul.f32 %v2908_v63, %v1529_v22 }
 0x267   : > { %v1873_v17 = vadd.f32 %v1872_v14, %v1779_v6  ;;  %v1417_v20 = vpop.f32.mrb[14].mxu1  ;;  %v1533_v58 = vmax.f32 %v1406_v11, 0.0  ;;  %v1416_v48 = vadd.f32 %v1415_v18, %v2872_v35  ;;  %v1786_v21 = vmul.f32 %v1656_v51, %v1530_v56  ;;  %v1676_v35 = vpop.permute.xlu0 %1675 }
 0x268   : > { %v1837_v50 = vadd.f32 %v1836_v52, %v1780_v12  ;;  %v1419_v19 = vpop.f32.mrb[15].mxu1  ;;  %v1534_v61 = vmax.f32 %v1408_v8, 0.0  ;;  %v1418_v0 = vadd.f32 %v1417_v20, %v2870_v34  ;;  %v1787_v62 = vmul.f32 %v1656_v51, %v1531_v55 }
 0x269   : > { %v1874_v9 = vadd.f32 %v1873_v17, %v1781_v16  ;;  %v1535_v3 = vmax.f32 %v1410_v54, 0.0  ;;  %v1420_v24 = vadd.f32 %v1419_v19, %v2870_v34  ;;  %v1788_v1 = vmul.f32 %v2918_v59, %v1532_v57  ;;  %v1691_v19 = vpop.permute.xlu1 %1690 }
 0x26a   : > { %v1838_v29 = vadd.f32 %v1837_v50, %v1782_v30  ;;  %v1536_v63 = vmax.f32 %v1414_v33, 0.0  ;;  %v1789_v14 = vmul.f32 %v2918_v59, %v1533_v58  ;;  %v1537_v10 = vmax.f32 %v1416_v48, 0.0 }
 0x26b   : > { %v1875_v27 = vadd.f32 %v1874_v9, %v1783_v23  ;;  %v1790_v13 = vmul.f32 %v1666_v53, %v1534_v61  ;;  %v1538_v34 = vmax.f32 %v1418_v0, 0.0  ;;  %v1791_v16 = vmul.f32 %v1666_v53, %v1535_v3  ;;  %v1686_v9 = vpop.permute.xlu0 %1685 }
 0x26c   : > { %v1839_v60 = vadd.f32 %v1838_v29, %v1784_v7  ;;  %v1539_v11 = vmax.f32 %v1420_v24, 0.0  ;;  %v1792_v30 = vmul.f32 %v1671_v15, %v1536_v63  ;;  %v1793_v50 = vmul.f32 %v1671_v15, %v1537_v10 }
 0x26d   : > { %v1876_v32 = vadd.f32 %v1875_v27, %v1785_v25  ;;  %v1423_v4 = vpop.f32.mrb[16].mxu1  ;;  %v1794_v23 = vmul.f32 %v1676_v35, %v1538_v34 }
 0x26e   : > { %v1840_v2 = vadd.f32 %v1839_v60, %v1786_v21  ;;  %v1424_v26 = vadd.f32 %v1423_v4, %v2876_v37  ;;  %v1425_v5 = vpop.f32.mrb[17].mxu1  ;;  %v1795_v7 = vmul.f32 %v1676_v35, %v1539_v11 }
 0x26f   : > { %v1877_v6 = vadd.f32 %v1876_v32, %v1787_v62  ;;  %v1426_v51 = vadd.f32 %v1425_v5, %v2876_v37  ;;  %v1427_v12 = vpop.f32.mrb[18].mxu1  ;;  %v1696_v5 = vpop.permute.xlu0 %1695 }
 0x270   : > { %v1841_v31 = vadd.f32 %v1840_v2, %v1788_v1  ;;  %v1428_v52 = vadd.f32 %v1427_v12, %v2874_v36  ;;  %v1429_v18 = vpop.f32.mrb[19].mxu1  ;;  %v1540_v56 = vmax.f32 %v1424_v26, 0.0  ;;  %v1701_v1 = vpop.permute.xlu1 %1700 }
 0x271   : > { %v1878_v22 = vadd.f32 %v1877_v6, %v1789_v14  ;;  %v1430_v17 = vadd.f32 %v1429_v18, %v2874_v36  ;;  %v1541_v8 = vmax.f32 %v1426_v51, 0.0 }
 0x272   : > { %v1842_v20 = vadd.f32 %v1841_v31, %v1790_v13  ;;  %v1542_v55 = vmax.f32 %v1428_v52, 0.0  ;;  %v1796_v33 = vmul.f32 %v1681_v28, %v1540_v56 }
 0x273   : > { %v1879_v59 = vadd.f32 %v1878_v22, %v1791_v16  ;;  %v1543_v57 = vmax.f32 %v1430_v17, 0.0  ;;  %v1797_v27 = vmul.f32 %v1681_v28, %v1541_v8 }
 0x274   : > { %v1843_v37 = vadd.f32 %v1842_v20, %v1792_v30  ;;  %v1798_v61 = vmul.f32 %v1686_v9, %v1542_v55  ;;  %v1711_v16 = vpop.permute.xlu1 %1710  ;;  %v1706_v20 = vpop.permute.xlu0 %1705 }
 0x275   : > { %v1880_v54 = vadd.f32 %v1879_v59, %v1793_v50  ;;  %v1433_v29 = vpop.f32.mrb[20].mxu1  ;;  %v1799_v32 = vmul.f32 %v1686_v9, %v1543_v57 }
 0x276   : > { %v1844_v53 = vadd.f32 %v1843_v37, %v1794_v23  ;;  %v1434_v25 = vadd.f32 %v1433_v29, %v2880_v39  ;;  %v1435_v36 = vpop.f32.mrb[21].mxu1 }
 0x277   : > { %v1881_v58 = vadd.f32 %v1880_v54, %v1795_v7  ;;  %v1436_v48 = vadd.f32 %v1435_v36, %v2880_v39  ;;  %v1437_v15 = vpop.f32.mrb[22].mxu1 }
 0x278   : > { %v1845_v21 = vadd.f32 %v1844_v53, %v1796_v33  ;;  %v1544_v60 = vmax.f32 %v1434_v25, 0.0  ;;  %v1438_v0 = vadd.f32 %v1437_v15, %v2878_v38  ;;  %v1439_v62 = vpop.f32.mrb[23].mxu1  ;;  %v1716_v53 = vpop.permute.xlu0 %1715 }
 0x279   : > { %v1882_v3 = vadd.f32 %v1881_v58, %v1797_v27  ;;  %v1545_v24 = vmax.f32 %v1436_v48, 0.0  ;;  %v1440_v4 = vadd.f32 %v1439_v62, %v2878_v38 }
 0x27a   : > { %v1846_v2 = vadd.f32 %v1845_v21, %v1798_v61  ;;  %v1800_v63 = vmul.f32 %v1691_v19, %v1544_v60  ;;  %v1546_v26 = vmax.f32 %v1438_v0, 0.0 }
 0x27b   : > { %v1883_v28 = vadd.f32 %v1882_v3, %v1799_v32  ;;  %v1801_v35 = vmul.f32 %v1691_v19, %v1545_v24  ;;  %v1547_v39 = vmax.f32 %v1440_v4, 0.0 }
 0x27c   : > { %v1847_v14 = vadd.f32 %v1846_v2, %v1800_v63  ;;  %v1802_v6 = vmul.f32 %v1696_v5, %v1546_v26  ;;  %v1726_v24 = vpop.permute.xlu0 %1725 }
 0x27d   : > { %v1884_v10 = vadd.f32 %v1883_v28, %v1801_v35  ;;  %v1803_v51 = vmul.f32 %v1696_v5, %v1547_v39  ;;  %v1443_v12 = vpop.f32.mrb[24].mxu1 }
 0x27e   : > { %v1848_v13 = vadd.f32 %v1847_v14, %v1802_v6  ;;  %v1444_v31 = vadd.f32 %v1443_v12, %v2884_v41  ;;  %v1445_v34 = vpop.f32.mrb[25].mxu1 }
 0x27f   : > { %v1885_v52 = vadd.f32 %v1884_v10, %v1803_v51  ;;  %v1446_v38 = vadd.f32 %v1445_v34, %v2884_v41  ;;  %v1447_v18 = vpop.f32.mrb[26].mxu1  ;;  %v1721_v41 = vpop.permute.xlu1 %1720 }
 0x280   : > { %v1548_v22 = vmax.f32 %v1444_v31, 0.0  ;;  %v1448_v11 = vadd.f32 %v1447_v18, %v2882_v40  ;;  %v1449_v17 = vpop.f32.mrb[27].mxu1  ;;  %v1137_v31 = vpop.permute.xlu0 %1136 }
 0x281   : > { %v1549_v30 = vmax.f32 %v1446_v38, 0.0  ;;  %v1450_v56 = vadd.f32 %v1449_v17, %v2882_v40 }
 0x282   : > { %v1804_v59 = vmul.f32 %v1701_v1, %v1548_v22  ;;  %v1550_v50 = vmax.f32 %v1448_v11, 0.0 }
 0x283   : > { %v1805_v8 = vmul.f32 %v1701_v1, %v1549_v30  ;;  %v1551_v19 = vmax.f32 %v1450_v56, 0.0  ;;  %v1731_v62 = vpop.permute.xlu1 %1730 }
 0x284   : > { %v1849_v37 = vadd.f32 %v1848_v13, %v1804_v59  ;;  %v1806_v23 = vmul.f32 %v1706_v20, %v1550_v50 }
 0x285   : > { %v1886_v55 = vadd.f32 %v1885_v52, %v1805_v8  ;;  %v1807_v9 = vmul.f32 %v1706_v20, %v1551_v19  ;;  %v1453_v54 = vpop.f32.mrb[28].mxu1 }
 0x286   : > { %v1850_v7 = vadd.f32 %v1849_v37, %v1806_v23  ;;  %v1454_v57 = vadd.f32 %v1453_v54, %v2888_v43  ;;  %v1455_v29 = vpop.f32.mrb[29].mxu1  ;;  %v1142_v37 = vpop.permute.xlu0 %1141 }
 0x287   : > { %v1887_v33 = vadd.f32 %v1886_v55, %v1807_v9  ;;  %v1456_v25 = vadd.f32 %v1455_v29, %v2888_v43  ;;  %v1457_v36 = vpop.f32.mrb[30].mxu1  ;;  %v1736_v51 = vpop.permute.xlu1 %1735 }
 0x288   : > { %v1552_v40 = vmax.f32 %v1454_v57, 0.0  ;;  %v1458_v58 = vadd.f32 %v1457_v36, %v2886_v42  ;;  %v1459_v27 = vpop.f32.mrb[31].mxu1 }
 0x289   : > { %v1553_v48 = vmax.f32 %v1456_v25, 0.0  ;;  %v1460_v15 = vadd.f32 %v1459_v27, %v2886_v42 }
 0x28a   : > { %v1808_v21 = vmul.f32 %v1711_v16, %v1552_v40  ;;  %v1554_v61 = vmax.f32 %v1458_v58, 0.0  ;;  %v1147_v27 = vpop.permute.xlu0 %1146 }
 0x28b   : > { %v1809_v60 = vmul.f32 %v1711_v16, %v1553_v48  ;;  %v1555_v0 = vmax.f32 %v1460_v15, 0.0 }
 0x28c   : > { %v1851_v3 = vadd.f32 %v1850_v7, %v1808_v21  ;;  %v1810_v32 = vmul.f32 %v1716_v53, %v1554_v61 }
 0x28d   : > { %v1888_v4 = vadd.f32 %v1887_v33, %v1809_v60  ;;  %v1811_v1 = vmul.f32 %v1716_v53, %v1555_v0  ;;  %v1463_v2 = vpop.f32.mrb[32].mxu1 }
 0x28e   : > { %v1852_v43 = vadd.f32 %v1851_v3, %v1810_v32  ;;  %v1464_v63 = vadd.f32 %v1463_v2, %v2892_v45  ;;  %v1465_v26 = vpop.f32.mrb[33].mxu1 }
 0x28f   : > { %v1889_v5 = vadd.f32 %v1888_v4, %v1811_v1  ;;  %v1466_v28 = vadd.f32 %v1465_v26, %v2892_v45  ;;  %v1467_v35 = vpop.f32.mrb[34].mxu1 }
 0x290   : > { %v1556_v42 = vmax.f32 %v1464_v63, 0.0  ;;  %v1468_v39 = vadd.f32 %v1467_v35, %v2890_v44  ;;  %v1469_v14 = vpop.f32.mrb[35].mxu1  ;;  %v1152_v63 = vpop.permute.xlu0 %1151 }
 0x291   : > { %v1557_v6 = vmax.f32 %v1466_v28, 0.0  ;;  %v1470_v10 = vadd.f32 %v1469_v14, %v2890_v44  ;;  %v1741_v44 = vpop.permute.xlu1 %1740 }
 0x292   : > { %v1812_v12 = vmul.f32 %v1721_v41, %v1556_v42  ;;  %v1558_v13 = vmax.f32 %v1468_v39, 0.0 }
 0x293   : > { %v1813_v34 = vmul.f32 %v1721_v41, %v1557_v6  ;;  %v1559_v52 = vmax.f32 %v1470_v10, 0.0 }
 0x294   : > { %v1853_v38 = vadd.f32 %v1852_v43, %v1812_v12  ;;  %v1814_v18 = vmul.f32 %v1726_v24, %v1558_v13 }
 0x295   : > { %v1890_v16 = vadd.f32 %v1889_v5, %v1813_v34  ;;  %v1815_v22 = vmul.f32 %v1726_v24, %v1559_v52  ;;  %v1473_v11 = vpop.f32.mrb[36].mxu1 }
 0x296   : > { %v1854_v45 = vadd.f32 %v1853_v38, %v1814_v18  ;;  %v1474_v17 = vadd.f32 %v1473_v11, %v2896_v47  ;;  %v1475_v20 = vpop.f32.mrb[37].mxu1  ;;  %v1157_v18 = vpop.permute.xlu0 %1156 }
 0x297   : > { %v1891_v30 = vadd.f32 %v1890_v16, %v1815_v22  ;;  %v1476_v56 = vadd.f32 %v1475_v20, %v2896_v47  ;;  %v1477_v59 = vpop.f32.mrb[38].mxu1  ;;  %v1746_v47 = vpop.permute.xlu1 %1745 }
 0x298   : > { %v1560_v50 = vmax.f32 %v1474_v17, 0.0  ;;  %v1478_v8 = vadd.f32 %v1477_v59, %v2894_v46  ;;  %v1479_v19 = vpop.f32.mrb[39].mxu1 }
 0x299   : > { %v1561_v23 = vmax.f32 %v1476_v56, 0.0  ;;  %v1480_v55 = vadd.f32 %v1479_v19, %v2894_v46 }
 0x29a   : > { %v1816_v9 = vmul.f32 %v1731_v62, %v1560_v50  ;;  %v1562_v54 = vmax.f32 %v1478_v8, 0.0 }
 0x29b   : > { %v1817_v41 = vmul.f32 %v1731_v62, %v1561_v23  ;;  %v1563_v7 = vmax.f32 %v1480_v55, 0.0  ;;  %v1751_v1 = vpop.permute.xlu1 %1750 }
 0x29c   : > { %v1855_v57 = vadd.f32 %v1854_v45, %v1816_v9  ;;  %v1818_v29 = vmul.f32 %v1736_v51, %v1562_v54  ;;  %v1761_v9 = vpop.permute.xlu0 %1760 }
 0x29d   : > { %v1892_v53 = vadd.f32 %v1891_v30, %v1817_v41  ;;  %v1819_v33 = vmul.f32 %v1736_v51, %v1563_v7  ;;  %v1483_v25 = vpop.f32.mrb[40].mxu1 }
 0x29e   : > { %v1856_v36 = vadd.f32 %v1855_v57, %v1818_v29  ;;  %v1484_v40 = vadd.f32 %v1483_v25, %v2898_v49  ;;  %v1485_v58 = vpop.f32.mrb[41].mxu1 }
 0x29f   : > { %v1893_v48 = vadd.f32 %v1892_v53, %v1819_v33  ;;  %v1486_v15 = vadd.f32 %v1485_v58, %v2898_v49  ;;  %v1487_v21 = vpop.f32.mrb[42].mxu1  ;;  %v1756_v38 = vpop.permute.xlu1 %1755 }
 0x2a0   : > { %v1564_v46 = vmax.f32 %v1484_v40, 0.0  ;;  %v1488_v61 = vadd.f32 %v1487_v21, %v1137_v31  ;;  %v1489_v60 = vpop.f32.mrb[43].mxu1 }
 0x2a1   : > { %v1565_v0 = vmax.f32 %v1486_v15, 0.0  ;;  %v1490_v62 = vadd.f32 %v1489_v60, %v1137_v31 }
 0x2a2   : > { %v1820_v3 = vmul.f32 %v1741_v44, %v1564_v46  ;;  %v1566_v32 = vmax.f32 %v1488_v61, 0.0 }
 0x2a3   : > { %v1821_v24 = vmul.f32 %v1741_v44, %v1565_v0  ;;  %v1567_v4 = vmax.f32 %v1490_v62, 0.0  ;;  %v1766_v29 = vpop.permute.xlu1 %1765  ;;  %v2289_v0 = vmov 1966171168  }
 0x2a4   : > { %v1857_v2 = vadd.f32 %v1856_v36, %v1820_v3  ;;  %v1822_v43 = vmul.f32 %v1746_v47, %v1566_v32  ;;  %v1914_v62 = vunpack.c.l.s4 %v2289_v0  ;;  %v1916_v3 = vlaneseq }
 0x2a5   : > { %v1894_v26 = vadd.f32 %v1893_v48, %v1821_v24  ;;  %v1823_v5 = vmul.f32 %v1746_v47, %v1567_v4  ;;  %v1493_v28 = vpop.f32.mrb[44].mxu1 }
 0x2a6   : > { %v1858_v35 = vadd.f32 %v1857_v2, %v1822_v43  ;;  %v1494_v42 = vadd.f32 %v1493_v28, %v1142_v37  ;;  %v1495_v49 = vpop.f32.mrb[45].mxu1  ;;  %v1915_v43 = vunpack.c.0.s8 %v1914_v62  ;;  %vm1930_vm2 = vcmp.lt.s32.totalorder %v1916_v3, 256 }
 0x2a7   : > { %v1895_v39 = vadd.f32 %v1894_v26, %v1823_v5  ;;  %v1496_v14 = vadd.f32 %v1495_v49, %v1142_v37  ;;  %v1497_v6 = vpop.f32.mrb[46].mxu1 }
 0x2a8   : > { %v1568_v10 = vmax.f32 %v1494_v42, 0.0  ;;  %v1498_v51 = vadd.f32 %v1497_v6, %v1147_v27  ;;  %v1499_v12 = vpop.f32.mrb[47].mxu1 }
 0x2a9   : > { %v1569_v13 = vmax.f32 %v1496_v14, 0.0  ;;  %v1500_v31 = vadd.f32 %v1499_v12, %v1147_v27 }
 0x2aa   : > { %v1824_v34 = vmul.f32 %v1751_v1, %v1568_v10  ;;  %v1570_v52 = vmax.f32 %v1498_v51, 0.0 }
 0x2ab   : > { %v1825_v16 = vmul.f32 %v1751_v1, %v1569_v13  ;;  %v1571_v22 = vmax.f32 %v1500_v31, 0.0  ;;  %v1907_v1 = vstv %s1906_s22 }
 0x2ac   : > { %v1859_v11 = vadd.f32 %v1858_v35, %v1824_v34  ;;  %v1826_v45 = vmul.f32 %v1756_v38, %v1570_v52 }
 0x2ad   : > { %v1896_v17 = vadd.f32 %v1895_v39, %v1825_v16  ;;  %v1827_v20 = vmul.f32 %v1756_v38, %v1571_v22  ;;  %v1503_v30 = vpop.f32.mrb[48].mxu1 }
 0x2ae   : > { %v1860_v56 = vadd.f32 %v1859_v11, %v1826_v45  ;;  %v1504_v59 = vadd.f32 %v1503_v30, %v1152_v63  ;;  %v1505_v44 = vpop.f32.mrb[49].mxu1 }
 0x2af   : > { %v1897_v50 = vadd.f32 %v1896_v17, %v1827_v20  ;;  %v1506_v8 = vadd.f32 %v1505_v44, %v1152_v63  ;;  %v1507_v19 = vpop.f32.mrb[50].mxu1  ;;  %v1917_v63 = vshrl.u32 %v1916_v3, 7 }
 0x2b0   : > { %v1572_v37 = vmax.f32 %v1504_v59, 0.0  ;;  %v1508_v23 = vadd.f32 %v1507_v19, %v1157_v18  ;;  %v1509_v55 = vpop.f32.mrb[51].mxu1 }
 0x2b1   : > { %v1573_v54 = vmax.f32 %v1506_v8, 0.0  ;;  %v1510_v41 = vadd.f32 %v1509_v55, %v1157_v18  ;;  %v1918_v42 = vsub.s32 %v1915_v43, %v1917_v63 }
 0x2b2   : > { %v1828_v7 = vmul.f32 %v1761_v9, %v1572_v37  ;;  %v1574_v57 = vmax.f32 %v1508_v23, 0.0 }
 0x2b3   : > { %v1829_v53 = vmul.f32 %v1761_v9, %v1573_v54  ;;  %v1575_v33 = vmax.f32 %v1510_v41, 0.0 }
 0x2b4   : > { %v1861_v25 = vadd.f32 %v1860_v56, %v1828_v7  ;;  %v1830_v47 = vmul.f32 %v1766_v29, %v1574_v57 }
 0x2b5   : > { %v1898_v36 = vadd.f32 %v1897_v50, %v1829_v53  ;;  %v1831_v40 = vmul.f32 %v1766_v29, %v1575_v33 }
 0x2b6   : > { %v1862_v58 = vadd.f32 %v1861_v25, %v1830_v47 }
 0x2b7   : > { %v1899_v27 = vadd.f32 %v1898_v36, %v1831_v40 }
 0x2b8   : > { %v1863_v48 = vrot.slane %v1862_v58, 4 }
 0x2b9   : > { %v1900_v15 = vrot.slane %v1899_v27, 4 }
 0x2ba   : > { %v1864_v21 = vadd.f32 %v1863_v48, %v1862_v58 }
 0x2bb   : > { %v1901_v46 = vadd.f32 %v1900_v15, %v1899_v27 }
 0x2bc   : > { %v1865_v61 = vrot.slane %v1864_v21, 2 }
 0x2bd   : > { %v1902_v60 = vrot.slane %v1901_v46, 2 }
 0x2be   : > { %v1866_v32 = vadd.f32 %v1865_v61, %v1864_v21 }
 0x2bf   : > { %v1903_v24 = vadd.f32 %v1902_v60, %v1901_v46 }
 0x2c0   : > { %v1867_v4 = vrot.slane %v1866_v32, 1 }
 0x2c1   : > { %v1904_v2 = vrot.slane %v1903_v24, 1 }
 0x2c2   : > { %v1868_v26 = vadd.f32 %v1867_v4, %v1866_v32 }
 0x2c3   : > { %v1905_v5 = vadd.f32 %v1904_v2, %v1903_v24 }
 0x2c4   : > { %v1908_v28 = vadd.f32 %v1907_v1, %v1868_v26 }
 0x2c5   : > { %v1909_v35 = vadd.f32 %v1907_v1, %v1905_v5 }
 0x2c7   : > { %v1912_v49 = vcombine.low %v1908_v28, %v1909_v35 }
 0x2c9   : > { %v1919_v39 = vrot.slane %v1912_v49, %v1918_v42 }
 0x2cb   : > { %v1926_v14 = vrot.slane %v1919_v39, %v1918_v42 }
 0x2cd   : > { %1932 = vst.msk [vmem:[%s273_s30] sm:$0x3] %vm1930_vm2, %v1926_v14 }
 0x2ce   : > { %2237 = shalt.err (!%p2234_p3)
}
 0x2cf   : > { %s2238_s20 = scalar_lea.hbm %s2973_s15, 32  ;;  %s2242_s23 = scalar_lea.hbm %s3022_s7, 64 }
 0x2d0   : > { %p2239_p4 = scmp.ne.s32.totalorder %s2973_s15, %s2238_s20  ;;  %p2243_p9 = scmp.lt.u32.totalorder %s2973_s15, %s3022_s7 }
 0x2d1   : > { %p2244_p10 = scmp.lt.u32.totalorder %s2242_s23, %s2238_s20  ;;  %p2246_p12 = scmp.lt.u32.totalorder %s2238_s20, %s2973_s15 }
 0x2d2   : > { %p2240_p7 = pnand %p2239_p4, %p2372_p5 }
 0x2d3   : > { %p2245_p11 = por %p2244_p10, %p2243_p9 }
 0x2d4   : > { %p2241_p8 = pneg %p2240_p7 }
 0x2d5   : > { %p2247_p13 = por %p2246_p12, %p2245_p11 }
 0x2d7   : > { %p2248_p0 = pnand %p2247_p13, %p2241_p8 }
 0x2d9   : > { %2251 = shalt.err (!%p2248_p0)
}
 0x2da   : > { %2117 = dma.vmem_to_hbm [thread:$0]  (%p2372_p5), %s2975_s9, 32, %s2973_s15, %s1934_s16  }
 0x2db PF: > { %p2123_p1 = scmp.ge.s32.totalorder %s2286_s29, 2  ;;  %s1960_s30 = sand.u32 1, %s2274_s26  }
 0x2dc   : > { %s1961_s10 = scalar_lea.sflag [#allocation4], %s1960_s30 }
 0x2dd   : > { %p2120_p2 = pnand %p2123_p1, %p2376_p6 }
 0x2df   : > { %2269 = dma.done.wait (!%p2120_p2), %s1961_s10, 32  }
 0x2e0   : > { %2271 = vsyncadd (!%p2120_p2), %s1961_s10, 4294967264  ;;  %p18_p3 = scmp.ge.s32.totalorder %s2359_s8, 4   ;;  %s3025_s26 = smov %s2278_s27 }
 0x2e1   : > { %s3026_s27 = smov %s2282_s28  ;;  %s3027_s28 = smov %s2370_s11 }
 0x2e2   : > { %s3028_s29 = smov %s2359_s8  ;;  %20 = sbr.rel (!%p18_p3) target bundleno = 5 (0x5), region = 83 }
 0x2e9   :  { %1966 = vsyncpa [#allocation4], 1 }
 0x2ea   :  { %1968 = vsyncpa [#allocation4 + $0x1], 1 }

</bundles_post_ra>
